<compile_context>
chip_gen: v7x
topology: tpu7x:2x2x1
jax: 0.10.0
libtpu: 0.0.40
codegen_flags: <defaults>
</compile_context>

<pallas_src>
import functools
import math

import jax
import jax.numpy as jnp
from jax.experimental import pallas as pl
from jax.experimental.pallas import tpu as pltpu


@functools.lru_cache(maxsize=None)
def _vmem_limit_bytes():
    """Generation-aware scoped-VMEM budget (~75% of per-core physical VMEM)."""
    try:
        cap = int(getattr(pltpu.get_tpu_info(), "vmem_capacity_bytes",
                          64 * 1024 * 1024))
    except Exception:
        cap = 64 * 1024 * 1024
    return max(32 * 1024 * 1024, (cap * 3) // 4)


# ---------------------------------------------------------------------------
# Stage 1: fused Q/K/V projection + rotary embedding.
# grid = (KVH, B, S//TS); kv-head axis OUTERMOST so the weight blocks keep a
# constant block index across the whole inner (batch, seq-block) sweep and
# are DMA'd once per kv head.
# ---------------------------------------------------------------------------
def _make_qkv_kernel(TS, H, DH, G):
    half = DH // 2
    use_roll = (DH % 128 == 0)  # lane-aligned head dim -> free XLU rotate

    def _roll_half(t):
        # concat([t2, t1]); the rotate_half sign is folded into the sin table.
        if use_roll:
            return pltpu.roll(t, shift=half, axis=-1)
        return jnp.concatenate([t[:, half:], t[:, :half]], axis=-1)

    def kernel(x_ref, sin_ref, cos_ref, wq_ref, wk_ref, wv_ref,
               q_ref, k_ref, v_ref):
        x = x_ref[0]                 # (TS, H)  bf16
        sin_s = sin_ref[...]         # (TS, DH) f32, sign-folded
        cos = cos_ref[...]           # (TS, DH) f32

        def rope(t):                 # t: (TS, DH) f32
            return t * cos + _roll_half(t) * sin_s

        # K / V for this kv head (RoPE applied to K once per kv head only).
        k = jnp.dot(x, wk_ref[0], preferred_element_type=jnp.float32)
        v = jnp.dot(x, wv_ref[0], preferred_element_type=jnp.float32)
        k_ref[0, 0] = rope(k).astype(k_ref.dtype)
        v_ref[0, 0] = v.astype(v_ref.dtype)

        # All G query heads of this GQA group in one wide MXU matmul.
        # (The 1/sqrt(DH) softmax scale is pre-folded into wq on the host.)
        q = jnp.dot(x, wq_ref[0], preferred_element_type=jnp.float32)  # (TS, G*DH)
        # TODO(synk): a fully-unrolled lax.fori_loop would bound the per-head
        # live ranges of the (TS, G*DH) f32 intermediate a bit tighter.
        for g in range(G):
            q_ref[0, g] = rope(q[:, g * DH:(g + 1) * DH]).astype(q_ref.dtype)

    return kernel


# ---------------------------------------------------------------------------
# Stage 2: causal flash attention with the whole GQA group per step and an
# in-kernel kv loop.  grid = (B, KVH, S//TQ); K/V for one kv head (full
# (S, DH) row) are delivered once per (b, kv head) and re-used across all
# q blocks; the kv reduction runs inside the kernel with trip count qi+1.
# ---------------------------------------------------------------------------
def _make_flash_kernel(G, TQ, TK, DH):
    GTQ = G * TQ

    def kernel(q_ref, k_ref, v_ref, o_ref, m_sc, l_sc, acc_sc):
        qi = pl.program_id(2)

        # GQA fold: all G query heads of this kv group as one (G*TQ, DH) slab.
        q = q_ref[0].reshape(GTQ, DH)                         # bf16

        m_sc[...] = jnp.full(m_sc.shape, -jnp.inf, dtype=jnp.float32)
        l_sc[...] = jnp.zeros(l_sc.shape, dtype=jnp.float32)
        acc_sc[...] = jnp.zeros(acc_sc.shape, dtype=jnp.float32)

        def online_update(k_blk, v_blk, masked):
            s = jax.lax.dot_general(
                q, k_blk, (((1,), (1,)), ((), ())),
                preferred_element_type=jnp.float32)           # (GTQ, TK)
            if masked:
                # Diagonal block only (TQ == TK): mask keys above the diag.
                qpos = jax.lax.broadcasted_iota(jnp.int32, (GTQ, TK), 0) % TQ
                kpos = jax.lax.broadcasted_iota(jnp.int32, (GTQ, TK), 1)
                s = jnp.where(kpos <= qpos, s, -jnp.inf)
            m_prev = m_sc[...]                                 # (GTQ, 1)
            m_new = jnp.maximum(m_prev, jnp.max(s, axis=-1, keepdims=True))
            alpha = jnp.exp(m_prev - m_new)
            p = jnp.exp(s - m_new)                             # (GTQ, TK) f32
            l_sc[...] = alpha * l_sc[...] + jnp.sum(p, axis=-1, keepdims=True)
            acc_sc[...] = alpha * acc_sc[...] + jnp.dot(
                p.astype(v_blk.dtype), v_blk,
                preferred_element_type=jnp.float32)
            m_sc[...] = m_new

        # Interior kv chunks: strictly below the diagonal -> no mask needed.
        def body(ki, carry):
            start = pl.multiple_of(ki * TK, TK)
            online_update(k_ref[0, 0, pl.ds(start, TK), :],
                          v_ref[0, 0, pl.ds(start, TK), :], masked=False)
            return carry

        jax.lax.fori_loop(0, qi, body, 0)

        # Diagonal kv chunk: the only one that needs the causal mask.
        dstart = pl.multiple_of(qi * TK, TK)
        online_update(k_ref[0, 0, pl.ds(dstart, TK), :],
                      v_ref[0, 0, pl.ds(dstart, TK), :], masked=True)

        inv_l = pl.reciprocal(l_sc[...], approx=True)          # EUP, ~free
        o_ref[0] = (acc_sc[...] * inv_l).reshape(G, TQ, DH).astype(o_ref.dtype)

    return kernel


# ---------------------------------------------------------------------------
# Stage 3: output projection as a reduction over head-pairs into a lane-dense
# (TS, H) slab.  grid = (B, S//TS, NH//HP); head axis is the reduction.
# ---------------------------------------------------------------------------
def _make_oproj_kernel(HP):
    def kernel(y_ref, wo_ref, o_ref, acc_sc):
        hb = pl.program_id(2)

        @pl.when(hb == 0)
        def _init():
            acc_sc[...] = jnp.zeros(acc_sc.shape, dtype=jnp.float32)

        acc = acc_sc[...]
        # TODO(synk): true 256-deep contraction packing (flattening HP heads
        # into one (TS, HP*DH) operand) needs a (HP,TS,DH)->(TS,HP*DH)
        # relayout; HP heads per step here halves grid-step overhead instead.
        for p in range(HP):
            acc = acc + jnp.dot(y_ref[0, p], wo_ref[p],
                                preferred_element_type=jnp.float32)
        acc_sc[...] = acc

        @pl.when(hb == pl.num_programs(2) - 1)
        def _finalize():
            o_ref[0] = acc_sc[...].astype(o_ref.dtype)

    return kernel


# ---------------------------------------------------------------------------
# Wrapper
# ---------------------------------------------------------------------------
def _attention_forward(x, rotary, wq, wk, wv, wo, *, num_heads,
                       num_key_value_heads):
    B, S, H = x.shape
    NH = num_heads
    KVH = num_key_value_heads
    DH = H // NH
    G = NH // KVH
    scale = 1.0 / math.sqrt(DH)
    vmem_limit = _vmem_limit_bytes()

    TS = min(S, 512)             # seq tile for projection / output projection
    TQ = min(S, 512)             # flash query tile
    TK = TQ                      # in-kernel kv chunk (== TQ: diagonal == last)
    assert S % TS == 0 and S % TQ == 0

    cdt = jnp.bfloat16           # MXU operand dtype (f32 accumulation)

    # --- one-time layout plumbing (host/XLA side; cached in a real model) ---
    x_b = x.astype(cdt)
    # Q weights grouped per kv head: (KVH, H, G*DH); col g*DH+d <-> head h*G+g.
    # Softmax scale folded into wq (RoPE is linear, so this == scaling scores).
    wq_g = (wq.reshape(NH, DH, H).transpose(0, 2, 1)
              .reshape(KVH, G, H, DH).transpose(0, 2, 1, 3)
              .reshape(KVH, H, G * DH) * scale).astype(cdt)
    wk_h = wk.reshape(KVH, DH, H).transpose(0, 2, 1).astype(cdt)   # (KVH, H, DH)
    wv_h = wv.reshape(KVH, DH, H).transpose(0, 2, 1).astype(cdt)   # (KVH, H, DH)
    wo_h = wo.T.reshape(NH, DH, H).astype(cdt)                     # (NH, DH, H)

    sin, cos = rotary[0].astype(jnp.float32), rotary[1].astype(jnp.float32)
    half = DH // 2
    sin_signed = jnp.concatenate([-sin[:, :half], sin[:, half:]], axis=-1)

    NSB = S // TS
    NQB = S // TQ

    # ---------------- stage 1: Q/K/V projection + RoPE ----------------
    q_hm, k_hm, v_hm = pl.pallas_call(
        _make_qkv_kernel(TS, H, DH, G),
        out_shape=(
            jax.ShapeDtypeStruct((B, NH, S, DH), cdt),
            jax.ShapeDtypeStruct((B, KVH, S, DH), cdt),
            jax.ShapeDtypeStruct((B, KVH, S, DH), cdt),
        ),
        grid_spec=pltpu.PrefetchScalarGridSpec(
            num_scalar_prefetch=0,
            grid=(KVH, B, NSB),
            in_specs=[
                pl.BlockSpec((1, TS, H), lambda h, b, sb: (b, sb, 0)),
                pl.BlockSpec((TS, DH), lambda h, b, sb: (sb, 0)),
                pl.BlockSpec((TS, DH), lambda h, b, sb: (sb, 0)),
                pl.BlockSpec((1, H, G * DH), lambda h, b, sb: (h, 0, 0)),
                pl.BlockSpec((1, H, DH), lambda h, b, sb: (h, 0, 0)),
                pl.BlockSpec((1, H, DH), lambda h, b, sb: (h, 0, 0)),
            ],
            out_specs=(
                pl.BlockSpec((1, G, TS, DH), lambda h, b, sb: (b, h, sb, 0)),
                pl.BlockSpec((1, 1, TS, DH), lambda h, b, sb: (b, h, sb, 0)),
                pl.BlockSpec((1, 1, TS, DH), lambda h, b, sb: (b, h, sb, 0)),
            ),
        ),
        compiler_params=pltpu.CompilerParams(
            dimension_semantics=("parallel", "parallel", "parallel"),
            vmem_limit_bytes=vmem_limit,
        ),
    )(x_b, sin_signed, cos, wq_g, wk_h, wv_h)

    # ---------------- stage 2: causal flash attention (GQA-folded) ----------
    y_hm = pl.pallas_call(
        _make_flash_kernel(G, TQ, TK, DH),
        out_shape=jax.ShapeDtypeStruct((B, NH, S, DH), cdt),
        grid_spec=pltpu.PrefetchScalarGridSpec(
            num_scalar_prefetch=0,
            grid=(B, KVH, NQB),
            in_specs=[
                # All G query heads of kv group h (heads h*G .. h*G+G-1).
                pl.BlockSpec((1, G, TQ, DH), lambda b, h, qi: (b, h, qi, 0)),
                # Full (S, DH) K/V row for this kv head; block index is
                # constant across qi so it is DMA'd once per (b, kv head).
                pl.BlockSpec((1, 1, S, DH), lambda b, h, qi: (b, h, 0, 0)),
                pl.BlockSpec((1, 1, S, DH), lambda b, h, qi: (b, h, 0, 0)),
            ],
            out_specs=pl.BlockSpec((1, G, TQ, DH),
                                   lambda b, h, qi: (b, h, qi, 0)),
            scratch_shapes=[
                pltpu.VMEM((G * TQ, 1), jnp.float32),    # running max m
                pltpu.VMEM((G * TQ, 1), jnp.float32),    # running sum l
                pltpu.VMEM((G * TQ, DH), jnp.float32),   # output accumulator
            ],
        ),
        compiler_params=pltpu.CompilerParams(
            dimension_semantics=("parallel", "parallel", "parallel"),
            vmem_limit_bytes=vmem_limit,
        ),
    )(q_hm, k_hm, v_hm)

    # ---------------- stage 3: output projection ----------------
    HP = 2 if NH % 2 == 0 else 1
    NHB = NH // HP
    out = pl.pallas_call(
        _make_oproj_kernel(HP),
        out_shape=jax.ShapeDtypeStruct((B, S, H), x.dtype),
        grid_spec=pltpu.PrefetchScalarGridSpec(
            num_scalar_prefetch=0,
            grid=(B, NSB, NHB),
            in_specs=[
                pl.BlockSpec((1, HP, TS, DH), lambda b, sb, hb: (b, hb, sb, 0)),
                pl.BlockSpec((HP, DH, H), lambda b, sb, hb: (hb, 0, 0)),
            ],
            out_specs=pl.BlockSpec((1, TS, H), lambda b, sb, hb: (b, sb, 0)),
            scratch_shapes=[pltpu.VMEM((TS, H), jnp.float32)],
        ),
        compiler_params=pltpu.CompilerParams(
            dimension_semantics=("parallel", "parallel", "arbitrary"),
            vmem_limit_bytes=vmem_limit,
        ),
    )(y_hm, wo_h)

    return out


attention_forward = jax.jit(
    _attention_forward, static_argnames=("num_heads", "num_key_value_heads"))


# ---------------------------------------------------------------------------
# Plain-JAX (f32) replica of the PyTorch forward, for verification.
# ---------------------------------------------------------------------------
def _reference(x, rotary, wq, wk, wv, wo, num_heads, num_key_value_heads):
    B, S, H = x.shape
    DH = H // num_heads
    G = num_heads // num_key_value_heads

    q = (x @ wq.T).reshape(B, S, num_heads, DH)
    k = (x @ wk.T).reshape(B, S, num_key_value_heads, DH)
    v = (x @ wv.T).reshape(B, S, num_key_value_heads, DH)

    sin = rotary[0][None, :, None, :]
    cos = rotary[1][None, :, None, :]

    def rotate_half(t):
        return jnp.concatenate([-t[..., DH // 2:], t[..., :DH // 2]], axis=-1)

    q = q * cos + rotate_half(q) * sin
    k = k * cos + rotate_half(k) * sin

    k = jnp.repeat(k, G, axis=-2)
    v = jnp.repeat(v, G, axis=-2)

    q, k, v = (jnp.swapaxes(t, 1, 2) for t in (q, k, v))
    s = jnp.einsum("bhqd,bhkd->bhqk", q, k) / math.sqrt(DH)
    mask = jnp.tril(jnp.ones((S, S), dtype=bool))
    s = jnp.where(mask, s, -jnp.inf)
    p = jax.nn.softmax(s, axis=-1)
    y = jnp.einsum("bhqk,bhkd->bhqd", p, v)
    y = jnp.swapaxes(y, 1, 2).reshape(B, S, H)
    return y @ wo.T


if __name__ == "__main__":
    B, S, H = 2, 8, 32
    NUM_HEADS, NUM_KV_HEADS = 4, 2
    DH = H // NUM_HEADS

    key = jax.random.PRNGKey(0)
    kx, kq, kk, kv, ko = jax.random.split(key, 5)

    x = jax.random.normal(kx, (B, S, H), dtype=jnp.float32)

    # Deterministic parameter init (shapes from Attention.__init__).
    wq = 0.02 * jax.random.normal(kq, (NUM_HEADS * DH, H), dtype=jnp.float32)
    wk = 0.02 * jax.random.normal(kk, (NUM_KV_HEADS * DH, H), dtype=jnp.float32)
    wv = 0.02 * jax.random.normal(kv, (NUM_KV_HEADS * DH, H), dtype=jnp.float32)
    wo = 0.02 * jax.random.normal(ko, (H, H), dtype=jnp.float32)

    # Rotary table: [2, S, DH] with [sin; cos], standard RoPE frequencies.
    inv_freq = 1.0 / (10000.0 ** (jnp.arange(0, DH, 2, dtype=jnp.float32) / DH))
    angles = jnp.arange(S, dtype=jnp.float32)[:, None] * inv_freq[None, :]
    emb = jnp.concatenate([angles, angles], axis=-1)           # (S, DH)
    rotary = jnp.stack([jnp.sin(emb), jnp.cos(emb)], axis=0)   # (2, S, DH)

    out = attention_forward(
        x, rotary, wq, wk, wv, wo,
        num_heads=NUM_HEADS, num_key_value_heads=NUM_KV_HEADS,
    )
    out = jax.block_until_ready(out)

    ref = _reference(x, rotary, wq, wk, wv, wo, NUM_HEADS, NUM_KV_HEADS)
    assert out.shape == (B, S, H)
    # Tolerance loosened vs the f32 reference because the kernel feeds the MXU
    # bf16 operands (f32 accumulation) per the performance guidance.
    assert jnp.allclose(out, ref, atol=2e-3, rtol=2e-2), "mismatch vs reference"

    print("KERNEL_OK")
</pallas_src>

<mosaic_0001>
module attributes {stable_mosaic.version = 11 : i64} {
  func.func @kernel(%arg0: i32, %arg1: i32, %arg2: i32, %arg3: memref<1x8x32xbf16, #tpu.memory_space<vmem>>, %arg4: memref<8x8xf32, #tpu.memory_space<vmem>>, %arg5: memref<8x8xf32, #tpu.memory_space<vmem>>, %arg6: memref<1x32x16xbf16, #tpu.memory_space<vmem>>, %arg7: memref<1x32x8xbf16, #tpu.memory_space<vmem>>, %arg8: memref<1x32x8xbf16, #tpu.memory_space<vmem>>, %arg9: memref<1x2x8x8xbf16, #tpu.memory_space<vmem>>, %arg10: memref<1x1x8x8xbf16, #tpu.memory_space<vmem>>, %arg11: memref<1x1x8x8xbf16, #tpu.memory_space<vmem>>) attributes {dimension_semantics = [#tpu.dimension_semantics<parallel>, #tpu.dimension_semantics<parallel>, #tpu.dimension_semantics<parallel>], iteration_bounds = array<i64: 2, 2, 1>, scalar_prefetch = 0 : i64, scratch_operands = 0 : i64, tpu.core_type = #tpu.core_type<tc>, window_params = [{transform_indices = @transform_0, window_bounds = array<i64: 1, 8, 32>}, {transform_indices = @transform_1, window_bounds = array<i64: 8, 8>}, {transform_indices = @transform_2, window_bounds = array<i64: 8, 8>}, {transform_indices = @transform_3, window_bounds = array<i64: 1, 32, 16>}, {transform_indices = @transform_4, window_bounds = array<i64: 1, 32, 8>}, {transform_indices = @transform_5, window_bounds = array<i64: 1, 32, 8>}, {transform_indices = @transform_6, window_bounds = array<i64: 1, 2, 8, 8>}, {transform_indices = @transform_7, window_bounds = array<i64: 1, 1, 8, 8>}, {transform_indices = @transform_8, window_bounds = array<i64: 1, 1, 8, 8>}]} {
    %c0 = arith.constant 0 : index
    %c0_0 = arith.constant 0 : index
    %c0_1 = arith.constant 0 : index
    %0 = vector.load %arg3[%c0, %c0_0, %c0_1] : memref<1x8x32xbf16, #tpu.memory_space<vmem>>, vector<1x8x32xbf16>
    %1 = vector.shape_cast %0 : vector<1x8x32xbf16> to vector<8x32xbf16>
    %c0_2 = arith.constant 0 : index
    %c0_3 = arith.constant 0 : index
    %2 = vector.load %arg4[%c0_2, %c0_3] : memref<8x8xf32, #tpu.memory_space<vmem>>, vector<8x8xf32>
    %c0_4 = arith.constant 0 : index
    %c0_5 = arith.constant 0 : index
    %3 = vector.load %arg5[%c0_4, %c0_5] : memref<8x8xf32, #tpu.memory_space<vmem>>, vector<8x8xf32>
    %c0_6 = arith.constant 0 : index
    %c0_7 = arith.constant 0 : index
    %c0_8 = arith.constant 0 : index
    %4 = vector.load %arg7[%c0_6, %c0_7, %c0_8] : memref<1x32x8xbf16, #tpu.memory_space<vmem>>, vector<1x32x8xbf16>
    %5 = vector.shape_cast %4 : vector<1x32x8xbf16> to vector<32x8xbf16>
    %cst = arith.constant dense<0.000000e+00> : vector<8x8xf32>
    %6 = tpu.matmul %1, %5, %cst {dimension_numbers = #tpu.dot_dimension_numbers<[1], [0], [0], [1], [0, 0, 1, 1], [], []>} : vector<8x32xbf16>, vector<32x8xbf16>, vector<8x8xf32> -> vector<8x8xf32>
    %c0_9 = arith.constant 0 : index
    %c0_10 = arith.constant 0 : index
    %c0_11 = arith.constant 0 : index
    %7 = vector.load %arg8[%c0_9, %c0_10, %c0_11] : memref<1x32x8xbf16, #tpu.memory_space<vmem>>, vector<1x32x8xbf16>
    %8 = vector.shape_cast %7 : vector<1x32x8xbf16> to vector<32x8xbf16>
    %cst_12 = arith.constant dense<0.000000e+00> : vector<8x8xf32>
    %9 = tpu.matmul %1, %8, %cst_12 {dimension_numbers = #tpu.dot_dimension_numbers<[1], [0], [0], [1], [0, 0, 1, 1], [], []>} : vector<8x32xbf16>, vector<32x8xbf16>, vector<8x8xf32> -> vector<8x8xf32>
    %10 = arith.mulf %6, %3 : vector<8x8xf32>
    %11 = vector.extract_strided_slice %6 {offsets = [0, 4], sizes = [8, 4], strides = [1, 1]} : vector<8x8xf32> to vector<8x4xf32>
    %12 = vector.extract_strided_slice %6 {offsets = [0, 0], sizes = [8, 4], strides = [1, 1]} : vector<8x8xf32> to vector<8x4xf32>
    %13 = tpu.concatenate %11, %12 in 1 : vector<8x4xf32>, vector<8x4xf32> -> vector<8x8xf32>
    %14 = arith.mulf %13, %2 : vector<8x8xf32>
    %15 = arith.addf %10, %14 : vector<8x8xf32>
    %16 = arith.truncf %15 : vector<8x8xf32> to vector<8x8xbf16>
    %c0_13 = arith.constant 0 : index
    %c0_14 = arith.constant 0 : index
    %c0_15 = arith.constant 0 : index
    %c0_16 = arith.constant 0 : index
    %17 = vector.load %arg10[%c0_13, %c0_14, %c0_15, %c0_16] : memref<1x1x8x8xbf16, #tpu.memory_space<vmem>>, vector<1x1x8x8xbf16>
    %18 = vector.shape_cast %17 : vector<1x1x8x8xbf16> to vector<8x8xbf16>
    %19 = vector.shape_cast %16 : vector<8x8xbf16> to vector<1x1x8x8xbf16>
    tpu.vector_store %arg10[%c0_13, %c0_14, %c0_15, %c0_16], %19 {strides = array<i32>} : memref<1x1x8x8xbf16, #tpu.memory_space<vmem>>, vector<1x1x8x8xbf16>,
    %20 = arith.truncf %9 : vector<8x8xf32> to vector<8x8xbf16>
    %c0_17 = arith.constant 0 : index
    %c0_18 = arith.constant 0 : index
    %c0_19 = arith.constant 0 : index
    %c0_20 = arith.constant 0 : index
    %21 = vector.load %arg11[%c0_17, %c0_18, %c0_19, %c0_20] : memref<1x1x8x8xbf16, #tpu.memory_space<vmem>>, vector<1x1x8x8xbf16>
    %22 = vector.shape_cast %21 : vector<1x1x8x8xbf16> to vector<8x8xbf16>
    %23 = vector.shape_cast %20 : vector<8x8xbf16> to vector<1x1x8x8xbf16>
    tpu.vector_store %arg11[%c0_17, %c0_18, %c0_19, %c0_20], %23 {strides = array<i32>} : memref<1x1x8x8xbf16, #tpu.memory_space<vmem>>, vector<1x1x8x8xbf16>,
    %c0_21 = arith.constant 0 : index
    %c0_22 = arith.constant 0 : index
    %c0_23 = arith.constant 0 : index
    %24 = vector.load %arg6[%c0_21, %c0_22, %c0_23] : memref<1x32x16xbf16, #tpu.memory_space<vmem>>, vector<1x32x16xbf16>
    %25 = vector.shape_cast %24 : vector<1x32x16xbf16> to vector<32x16xbf16>
    %cst_24 = arith.constant dense<0.000000e+00> : vector<8x16xf32>
    %26 = tpu.matmul %1, %25, %cst_24 {dimension_numbers = #tpu.dot_dimension_numbers<[1], [0], [0], [1], [0, 0, 1, 1], [], []>} : vector<8x32xbf16>, vector<32x16xbf16>, vector<8x16xf32> -> vector<8x16xf32>
    %27 = vector.extract_strided_slice %26 {offsets = [0, 0], sizes = [8, 8], strides = [1, 1]} : vector<8x16xf32> to vector<8x8xf32>
    %28 = arith.mulf %27, %3 : vector<8x8xf32>
    %29 = vector.extract_strided_slice %27 {offsets = [0, 4], sizes = [8, 4], strides = [1, 1]} : vector<8x8xf32> to vector<8x4xf32>
    %30 = vector.extract_strided_slice %27 {offsets = [0, 0], sizes = [8, 4], strides = [1, 1]} : vector<8x8xf32> to vector<8x4xf32>
    %31 = tpu.concatenate %29, %30 in 1 : vector<8x4xf32>, vector<8x4xf32> -> vector<8x8xf32>
    %32 = arith.mulf %31, %2 : vector<8x8xf32>
    %33 = arith.addf %28, %32 : vector<8x8xf32>
    %34 = arith.truncf %33 : vector<8x8xf32> to vector<8x8xbf16>
    %c0_25 = arith.constant 0 : index
    %c0_26 = arith.constant 0 : index
    %c0_27 = arith.constant 0 : index
    %c0_28 = arith.constant 0 : index
    %35 = vector.load %arg9[%c0_25, %c0_26, %c0_27, %c0_28] : memref<1x2x8x8xbf16, #tpu.memory_space<vmem>>, vector<1x1x8x8xbf16>
    %36 = vector.shape_cast %35 : vector<1x1x8x8xbf16> to vector<8x8xbf16>
    %37 = vector.shape_cast %34 : vector<8x8xbf16> to vector<1x1x8x8xbf16>
    tpu.vector_store %arg9[%c0_25, %c0_26, %c0_27, %c0_28], %37 {strides = array<i32>} : memref<1x2x8x8xbf16, #tpu.memory_space<vmem>>, vector<1x1x8x8xbf16>,
    %38 = vector.extract_strided_slice %26 {offsets = [0, 8], sizes = [8, 8], strides = [1, 1]} : vector<8x16xf32> to vector<8x8xf32>
    %39 = arith.mulf %38, %3 : vector<8x8xf32>
    %40 = vector.extract_strided_slice %38 {offsets = [0, 4], sizes = [8, 4], strides = [1, 1]} : vector<8x8xf32> to vector<8x4xf32>
    %41 = vector.extract_strided_slice %38 {offsets = [0, 0], sizes = [8, 4], strides = [1, 1]} : vector<8x8xf32> to vector<8x4xf32>
    %42 = tpu.concatenate %40, %41 in 1 : vector<8x4xf32>, vector<8x4xf32> -> vector<8x8xf32>
    %43 = arith.mulf %42, %2 : vector<8x8xf32>
    %44 = arith.addf %39, %43 : vector<8x8xf32>
    %45 = arith.truncf %44 : vector<8x8xf32> to vector<8x8xbf16>
    %c0_29 = arith.constant 0 : index
    %c1 = arith.constant 1 : index
    %c0_30 = arith.constant 0 : index
    %c0_31 = arith.constant 0 : index
    %46 = vector.load %arg9[%c0_29, %c1, %c0_30, %c0_31] : memref<1x2x8x8xbf16, #tpu.memory_space<vmem>>, vector<1x1x8x8xbf16>
    %47 = vector.shape_cast %46 : vector<1x1x8x8xbf16> to vector<8x8xbf16>
    %48 = vector.shape_cast %45 : vector<8x8xbf16> to vector<1x1x8x8xbf16>
    tpu.vector_store %arg9[%c0_29, %c1, %c0_30, %c0_31], %48 {strides = array<i32>} : memref<1x2x8x8xbf16, #tpu.memory_space<vmem>>, vector<1x1x8x8xbf16>,
    return
  }
  func.func @transform_0(%arg0: i32, %arg1: i32, %arg2: i32) -> (i32, i32, i32) {
    %c0_i32 = arith.constant 0 : i32
    %c0_i32_0 = arith.constant 0 : i32
    return %arg1, %arg2, %c0_i32 : i32, i32, i32
  }
  func.func @transform_1(%arg0: i32, %arg1: i32, %arg2: i32) -> (i32, i32) {
    %c0_i32 = arith.constant 0 : i32
    %c0_i32_0 = arith.constant 0 : i32
    return %arg2, %c0_i32 : i32, i32
  }
  func.func @transform_2(%arg0: i32, %arg1: i32, %arg2: i32) -> (i32, i32) {
    %c0_i32 = arith.constant 0 : i32
    %c0_i32_0 = arith.constant 0 : i32
    return %arg2, %c0_i32 : i32, i32
  }
  func.func @transform_3(%arg0: i32, %arg1: i32, %arg2: i32) -> (i32, i32, i32) {
    %c0_i32 = arith.constant 0 : i32
    %c0_i32_0 = arith.constant 0 : i32
    %c0_i32_1 = arith.constant 0 : i32
    return %arg0, %c0_i32, %c0_i32_0 : i32, i32, i32
  }
  func.func @transform_4(%arg0: i32, %arg1: i32, %arg2: i32) -> (i32, i32, i32) {
    %c0_i32 = arith.constant 0 : i32
    %c0_i32_0 = arith.constant 0 : i32
    %c0_i32_1 = arith.constant 0 : i32
    return %arg0, %c0_i32, %c0_i32_0 : i32, i32, i32
  }
  func.func @transform_5(%arg0: i32, %arg1: i32, %arg2: i32) -> (i32, i32, i32) {
    %c0_i32 = arith.constant 0 : i32
    %c0_i32_0 = arith.constant 0 : i32
    %c0_i32_1 = arith.constant 0 : i32
    return %arg0, %c0_i32, %c0_i32_0 : i32, i32, i32
  }
  func.func @transform_6(%arg0: i32, %arg1: i32, %arg2: i32) -> (i32, i32, i32, i32) {
    %c0_i32 = arith.constant 0 : i32
    %c0_i32_0 = arith.constant 0 : i32
    return %arg1, %arg0, %arg2, %c0_i32 : i32, i32, i32, i32
  }
  func.func @transform_7(%arg0: i32, %arg1: i32, %arg2: i32) -> (i32, i32, i32, i32) {
    %c0_i32 = arith.constant 0 : i32
    %c0_i32_0 = arith.constant 0 : i32
    return %arg1, %arg0, %arg2, %c0_i32 : i32, i32, i32, i32
  }
  func.func @transform_8(%arg0: i32, %arg1: i32, %arg2: i32) -> (i32, i32, i32, i32) {
    %c0_i32 = arith.constant 0 : i32
    %c0_i32_0 = arith.constant 0 : i32
    return %arg1, %arg0, %arg2, %c0_i32 : i32, i32, i32, i32
  }
}

module attributes {stable_mosaic.version = 11 : i64} {
  func.func @kernel(%arg0: i32, %arg1: i32, %arg2: i32, %arg3: memref<1x2x8x8xbf16, #tpu.memory_space<vmem>>, %arg4: memref<1x1x8x8xbf16, #tpu.memory_space<vmem>>, %arg5: memref<1x1x8x8xbf16, #tpu.memory_space<vmem>>, %arg6: memref<1x2x8x8xbf16, #tpu.memory_space<vmem>>, %arg7: memref<16x1xf32, #tpu.memory_space<vmem>>, %arg8: memref<16x1xf32, #tpu.memory_space<vmem>>, %arg9: memref<16x8xf32, #tpu.memory_space<vmem>>) attributes {dimension_semantics = [#tpu.dimension_semantics<parallel>, #tpu.dimension_semantics<parallel>, #tpu.dimension_semantics<parallel>], iteration_bounds = array<i64: 2, 2, 1>, scalar_prefetch = 0 : i64, scratch_operands = 3 : i64, tpu.core_type = #tpu.core_type<tc>, window_params = [{transform_indices = @transform_0, window_bounds = array<i64: 1, 2, 8, 8>}, {transform_indices = @transform_1, window_bounds = array<i64: 1, 1, 8, 8>}, {transform_indices = @transform_2, window_bounds = array<i64: 1, 1, 8, 8>}, {transform_indices = @transform_3, window_bounds = array<i64: 1, 2, 8, 8>}]} {
    %c0 = arith.constant 0 : index
    %c0_0 = arith.constant 0 : index
    %c0_1 = arith.constant 0 : index
    %c0_2 = arith.constant 0 : index
    %0 = vector.load %arg3[%c0, %c0_0, %c0_1, %c0_2] : memref<1x2x8x8xbf16, #tpu.memory_space<vmem>>, vector<1x2x8x8xbf16>
    %1 = vector.shape_cast %0 : vector<1x2x8x8xbf16> to vector<2x8x8xbf16>
    %2 = vector.shape_cast %1 : vector<2x8x8xbf16> to vector<16x8xbf16>
    %cst = arith.constant 0xFF800000 : f32
    %3 = vector.broadcast %cst : f32 to vector<16x1xf32>
    %c0_3 = arith.constant 0 : index
    %c0_4 = arith.constant 0 : index
    %4 = vector.load %arg7[%c0_3, %c0_4] : memref<16x1xf32, #tpu.memory_space<vmem>>, vector<16x1xf32>
    tpu.vector_store %arg7[%c0_3, %c0_4], %3 {strides = array<i32>} : memref<16x1xf32, #tpu.memory_space<vmem>>, vector<16x1xf32>,
    %cst_5 = arith.constant 0.000000e+00 : f32
    %5 = vector.broadcast %cst_5 : f32 to vector<16x1xf32>
    %c0_6 = arith.constant 0 : index
    %c0_7 = arith.constant 0 : index
    %6 = vector.load %arg8[%c0_6, %c0_7] : memref<16x1xf32, #tpu.memory_space<vmem>>, vector<16x1xf32>
    tpu.vector_store %arg8[%c0_6, %c0_7], %5 {strides = array<i32>} : memref<16x1xf32, #tpu.memory_space<vmem>>, vector<16x1xf32>,
    %cst_8 = arith.constant 0.000000e+00 : f32
    %7 = vector.broadcast %cst_8 : f32 to vector<16x8xf32>
    %c0_9 = arith.constant 0 : index
    %c0_10 = arith.constant 0 : index
    %8 = vector.load %arg9[%c0_9, %c0_10] : memref<16x8xf32, #tpu.memory_space<vmem>>, vector<16x8xf32>
    tpu.vector_store %arg9[%c0_9, %c0_10], %7 {strides = array<i32>} : memref<16x8xf32, #tpu.memory_space<vmem>>, vector<16x8xf32>,
    %c0_i32 = arith.constant 0 : i32
    %c0_i32_11 = arith.constant 0 : i32
    %9 = arith.subi %arg2, %c0_i32_11 : i32
    %10 = arith.addi %c0_i32_11, %9 : i32
    %c1_i32 = arith.constant 1 : i32
    scf.for %arg10 = %c0_i32_11 to %10 step %c1_i32  : i32 {
      %c8_i32_49 = arith.constant 8 : i32
      %74 = arith.muli %arg10, %c8_i32_49 : i32
      %75 = tpu.assume_multiple %74, 8 : i32
      %c0_50 = arith.constant 0 : index
      %c0_51 = arith.constant 0 : index
      %76 = arith.index_cast %75 : i32 to index
      %c0_52 = arith.constant 0 : index
      %77 = vector.load %arg4[%c0_50, %c0_51, %76, %c0_52] : memref<1x1x8x8xbf16, #tpu.memory_space<vmem>>, vector<1x1x8x8xbf16>
      %78 = vector.shape_cast %77 : vector<1x1x8x8xbf16> to vector<8x8xbf16>
      %c0_53 = arith.constant 0 : index
      %c0_54 = arith.constant 0 : index
      %79 = arith.index_cast %75 : i32 to index
      %c0_55 = arith.constant 0 : index
      %80 = vector.load %arg5[%c0_53, %c0_54, %79, %c0_55] : memref<1x1x8x8xbf16, #tpu.memory_space<vmem>>, vector<1x1x8x8xbf16>
      %81 = vector.shape_cast %80 : vector<1x1x8x8xbf16> to vector<8x8xbf16>
      %cst_56 = arith.constant dense<0.000000e+00> : vector<16x8xf32>
      %82 = tpu.matmul %2, %78, %cst_56 {dimension_numbers = #tpu.dot_dimension_numbers<[1], [1], [0], [0], [0, 0, 1, 0], [], []>} : vector<16x8xbf16>, vector<8x8xbf16>, vector<16x8xf32> -> vector<16x8xf32>
      %c0_57 = arith.constant 0 : index
      %c0_58 = arith.constant 0 : index
      %83 = vector.load %arg7[%c0_57, %c0_58] : memref<16x1xf32, #tpu.memory_space<vmem>>, vector<16x1xf32>
      %cst_59 = arith.constant dense<0xFF800000> : vector<16xf32>
      %84 = vector.multi_reduction <maximumf>, %82, %cst_59 [1] : vector<16x8xf32> to vector<16xf32>
      %85 = vector.shape_cast %84 : vector<16xf32> to vector<16x1xf32>
      %86 = arith.maximumf %83, %85 : vector<16x1xf32>
      %87 = arith.subf %83, %86 : vector<16x1xf32>
      %88 = math.exp %87 : vector<16x1xf32>
      %89 = vector.broadcast %86 : vector<16x1xf32> to vector<16x8xf32>
      %90 = arith.subf %82, %89 : vector<16x8xf32>
      %91 = math.exp %90 : vector<16x8xf32>
      %c0_60 = arith.constant 0 : index
      %c0_61 = arith.constant 0 : index
      %92 = vector.load %arg8[%c0_60, %c0_61] : memref<16x1xf32, #tpu.memory_space<vmem>>, vector<16x1xf32>
      %93 = arith.mulf %88, %92 : vector<16x1xf32>
      %cst_62 = arith.constant dense<0.000000e+00> : vector<16xf32>
      %94 = vector.multi_reduction <add>, %91, %cst_62 [1] : vector<16x8xf32> to vector<16xf32>
      %95 = vector.shape_cast %94 : vector<16xf32> to vector<16x1xf32>
      %96 = arith.addf %93, %95 : vector<16x1xf32>
      %c0_63 = arith.constant 0 : index
      %c0_64 = arith.constant 0 : index
      %97 = vector.load %arg8[%c0_63, %c0_64] : memref<16x1xf32, #tpu.memory_space<vmem>>, vector<16x1xf32>
      tpu.vector_store %arg8[%c0_63, %c0_64], %96 {strides = array<i32>} : memref<16x1xf32, #tpu.memory_space<vmem>>, vector<16x1xf32>,
      %c0_65 = arith.constant 0 : index
      %c0_66 = arith.constant 0 : index
      %98 = vector.load %arg9[%c0_65, %c0_66] : memref<16x8xf32, #tpu.memory_space<vmem>>, vector<16x8xf32>
      %99 = vector.broadcast %88 : vector<16x1xf32> to vector<16x8xf32>
      %100 = arith.mulf %99, %98 : vector<16x8xf32>
      %101 = arith.truncf %91 : vector<16x8xf32> to vector<16x8xbf16>
      %cst_67 = arith.constant dense<0.000000e+00> : vector<16x8xf32>
      %102 = tpu.matmul %101, %81, %cst_67 {dimension_numbers = #tpu.dot_dimension_numbers<[1], [0], [0], [1], [0, 0, 1, 1], [], []>} : vector<16x8xbf16>, vector<8x8xbf16>, vector<16x8xf32> -> vector<16x8xf32>
      %103 = arith.addf %100, %102 : vector<16x8xf32>
      %c0_68 = arith.constant 0 : index
      %c0_69 = arith.constant 0 : index
      %104 = vector.load %arg9[%c0_68, %c0_69] : memref<16x8xf32, #tpu.memory_space<vmem>>, vector<16x8xf32>
      tpu.vector_store %arg9[%c0_68, %c0_69], %103 {strides = array<i32>} : memref<16x8xf32, #tpu.memory_space<vmem>>, vector<16x8xf32>,
      %c0_70 = arith.constant 0 : index
      %c0_71 = arith.constant 0 : index
      %105 = vector.load %arg7[%c0_70, %c0_71] : memref<16x1xf32, #tpu.memory_space<vmem>>, vector<16x1xf32>
      tpu.vector_store %arg7[%c0_70, %c0_71], %86 {strides = array<i32>} : memref<16x1xf32, #tpu.memory_space<vmem>>, vector<16x1xf32>,
    }
    %c8_i32 = arith.constant 8 : i32
    %11 = arith.muli %arg2, %c8_i32 : i32
    %12 = tpu.assume_multiple %11, 8 : i32
    %c0_12 = arith.constant 0 : index
    %c0_13 = arith.constant 0 : index
    %13 = arith.index_cast %12 : i32 to index
    %c0_14 = arith.constant 0 : index
    %14 = vector.load %arg4[%c0_12, %c0_13, %13, %c0_14] : memref<1x1x8x8xbf16, #tpu.memory_space<vmem>>, vector<1x1x8x8xbf16>
    %15 = vector.shape_cast %14 : vector<1x1x8x8xbf16> to vector<8x8xbf16>
    %c0_15 = arith.constant 0 : index
    %c0_16 = arith.constant 0 : index
    %16 = arith.index_cast %12 : i32 to index
    %c0_17 = arith.constant 0 : index
    %17 = vector.load %arg5[%c0_15, %c0_16, %16, %c0_17] : memref<1x1x8x8xbf16, #tpu.memory_space<vmem>>, vector<1x1x8x8xbf16>
    %18 = vector.shape_cast %17 : vector<1x1x8x8xbf16> to vector<8x8xbf16>
    %cst_18 = arith.constant dense<0.000000e+00> : vector<16x8xf32>
    %19 = tpu.matmul %2, %15, %cst_18 {dimension_numbers = #tpu.dot_dimension_numbers<[1], [1], [0], [0], [0, 0, 1, 0], [], []>} : vector<16x8xbf16>, vector<8x8xbf16>, vector<16x8xf32> -> vector<16x8xf32>
    %20 = tpu.iota {dimensions = array<i32: 0>} : vector<16x8xi32>
    %c8_i32_19 = arith.constant 8 : i32
    %c0_i32_20 = arith.constant 0 : i32
    %21 = arith.cmpi eq, %c8_i32_19, %c0_i32_20 : i32
    %c1_i32_21 = arith.constant 1 : i32
    %22 = arith.select %21, %c1_i32_21, %c8_i32_19 : i32
    %23 = vector.broadcast %22 : i32 to vector<16x8xi32>
    %24 = arith.remsi %20, %23 : vector<16x8xi32>
    %c0_i32_22 = arith.constant 0 : i32
    %25 = vector.broadcast %c0_i32_22 : i32 to vector<16x8xi32>
    %26 = arith.cmpi ne, %24, %25 : vector<16x8xi32>
    %c0_i32_23 = arith.constant 0 : i32
    %27 = vector.broadcast %c0_i32_23 : i32 to vector<16x8xi32>
    %28 = arith.cmpi slt, %24, %27 : vector<16x8xi32>
    %c0_i32_24 = arith.constant 0 : i32
    %29 = arith.cmpi slt, %22, %c0_i32_24 : i32
    %30 = vector.broadcast %29 : i1 to vector<16x8xi1>
    %31 = vector.broadcast %30 : vector<16x8xi1> to vector<16x8xi1>
    %32 = arith.xori %28, %31 : vector<16x8xi1>
    %33 = arith.andi %32, %26 : vector<16x8xi1>
    %34 = vector.broadcast %22 : i32 to vector<16x8xi32>
    %35 = arith.addi %24, %34 : vector<16x8xi32>
    %36 = arith.select %33, %35, %24 : vector<16x8xi1>, vector<16x8xi32>
    %37 = tpu.iota {dimensions = array<i32: 1>} : vector<16x8xi32>
    %38 = arith.cmpi sle, %37, %36 : vector<16x8xi32>
    %cst_25 = arith.constant 0xFF800000 : f32
    %39 = vector.broadcast %cst_25 : f32 to vector<16x8xf32>
    %40 = arith.select %38, %19, %39 : vector<16x8xi1>, vector<16x8xf32>
    %c0_26 = arith.constant 0 : index
    %c0_27 = arith.constant 0 : index
    %41 = vector.load %arg7[%c0_26, %c0_27] : memref<16x1xf32, #tpu.memory_space<vmem>>, vector<16x1xf32>
    %cst_28 = arith.constant dense<0xFF800000> : vector<16xf32>
    %42 = vector.multi_reduction <maximumf>, %40, %cst_28 [1] : vector<16x8xf32> to vector<16xf32>
    %43 = vector.shape_cast %42 : vector<16xf32> to vector<16x1xf32>
    %44 = arith.maximumf %41, %43 : vector<16x1xf32>
    %45 = arith.subf %41, %44 : vector<16x1xf32>
    %46 = math.exp %45 : vector<16x1xf32>
    %47 = vector.broadcast %44 : vector<16x1xf32> to vector<16x8xf32>
    %48 = arith.subf %40, %47 : vector<16x8xf32>
    %49 = math.exp %48 : vector<16x8xf32>
    %c0_29 = arith.constant 0 : index
    %c0_30 = arith.constant 0 : index
    %50 = vector.load %arg8[%c0_29, %c0_30] : memref<16x1xf32, #tpu.memory_space<vmem>>, vector<16x1xf32>
    %51 = arith.mulf %46, %50 : vector<16x1xf32>
    %cst_31 = arith.constant dense<0.000000e+00> : vector<16xf32>
    %52 = vector.multi_reduction <add>, %49, %cst_31 [1] : vector<16x8xf32> to vector<16xf32>
    %53 = vector.shape_cast %52 : vector<16xf32> to vector<16x1xf32>
    %54 = arith.addf %51, %53 : vector<16x1xf32>
    %c0_32 = arith.constant 0 : index
    %c0_33 = arith.constant 0 : index
    %55 = vector.load %arg8[%c0_32, %c0_33] : memref<16x1xf32, #tpu.memory_space<vmem>>, vector<16x1xf32>
    tpu.vector_store %arg8[%c0_32, %c0_33], %54 {strides = array<i32>} : memref<16x1xf32, #tpu.memory_space<vmem>>, vector<16x1xf32>,
    %c0_34 = arith.constant 0 : index
    %c0_35 = arith.constant 0 : index
    %56 = vector.load %arg9[%c0_34, %c0_35] : memref<16x8xf32, #tpu.memory_space<vmem>>, vector<16x8xf32>
    %57 = vector.broadcast %46 : vector<16x1xf32> to vector<16x8xf32>
    %58 = arith.mulf %57, %56 : vector<16x8xf32>
    %59 = arith.truncf %49 : vector<16x8xf32> to vector<16x8xbf16>
    %cst_36 = arith.constant dense<0.000000e+00> : vector<16x8xf32>
    %60 = tpu.matmul %59, %18, %cst_36 {dimension_numbers = #tpu.dot_dimension_numbers<[1], [0], [0], [1], [0, 0, 1, 1], [], []>} : vector<16x8xbf16>, vector<8x8xbf16>, vector<16x8xf32> -> vector<16x8xf32>
    %61 = arith.addf %58, %60 : vector<16x8xf32>
    %c0_37 = arith.constant 0 : index
    %c0_38 = arith.constant 0 : index
    %62 = vector.load %arg9[%c0_37, %c0_38] : memref<16x8xf32, #tpu.memory_space<vmem>>, vector<16x8xf32>
    tpu.vector_store %arg9[%c0_37, %c0_38], %61 {strides = array<i32>} : memref<16x8xf32, #tpu.memory_space<vmem>>, vector<16x8xf32>,
    %c0_39 = arith.constant 0 : index
    %c0_40 = arith.constant 0 : index
    %63 = vector.load %arg7[%c0_39, %c0_40] : memref<16x1xf32, #tpu.memory_space<vmem>>, vector<16x1xf32>
    tpu.vector_store %arg7[%c0_39, %c0_40], %44 {strides = array<i32>} : memref<16x1xf32, #tpu.memory_space<vmem>>, vector<16x1xf32>,
    %c0_41 = arith.constant 0 : index
    %c0_42 = arith.constant 0 : index
    %64 = vector.load %arg8[%c0_41, %c0_42] : memref<16x1xf32, #tpu.memory_space<vmem>>, vector<16x1xf32>
    %65 = tpu.reciprocal %64 {approx = true} : vector<16x1xf32> -> vector<16x1xf32>
    %c0_43 = arith.constant 0 : index
    %c0_44 = arith.constant 0 : index
    %66 = vector.load %arg9[%c0_43, %c0_44] : memref<16x8xf32, #tpu.memory_space<vmem>>, vector<16x8xf32>
    %67 = vector.broadcast %65 : vector<16x1xf32> to vector<16x8xf32>
    %68 = arith.mulf %66, %67 : vector<16x8xf32>
    %69 = vector.shape_cast %68 : vector<16x8xf32> to vector<2x8x8xf32>
    %70 = arith.truncf %69 : vector<2x8x8xf32> to vector<2x8x8xbf16>
    %c0_45 = arith.constant 0 : index
    %c0_46 = arith.constant 0 : index
    %c0_47 = arith.constant 0 : index
    %c0_48 = arith.constant 0 : index
    %71 = vector.load %arg6[%c0_45, %c0_46, %c0_47, %c0_48] : memref<1x2x8x8xbf16, #tpu.memory_space<vmem>>, vector<1x2x8x8xbf16>
    %72 = vector.shape_cast %71 : vector<1x2x8x8xbf16> to vector<2x8x8xbf16>
    %73 = vector.shape_cast %70 : vector<2x8x8xbf16> to vector<1x2x8x8xbf16>
    tpu.vector_store %arg6[%c0_45, %c0_46, %c0_47, %c0_48], %73 {strides = array<i32>} : memref<1x2x8x8xbf16, #tpu.memory_space<vmem>>, vector<1x2x8x8xbf16>,
    return
  }
  func.func @transform_0(%arg0: i32, %arg1: i32, %arg2: i32) -> (i32, i32, i32, i32) {
    %c0_i32 = arith.constant 0 : i32
    %c0_i32_0 = arith.constant 0 : i32
    return %arg0, %arg1, %arg2, %c0_i32 : i32, i32, i32, i32
  }
  func.func @transform_1(%arg0: i32, %arg1: i32, %arg2: i32) -> (i32, i32, i32, i32) {
    %c0_i32 = arith.constant 0 : i32
    %c0_i32_0 = arith.constant 0 : i32
    %c0_i32_1 = arith.constant 0 : i32
    return %arg0, %arg1, %c0_i32, %c0_i32_0 : i32, i32, i32, i32
  }
  func.func @transform_2(%arg0: i32, %arg1: i32, %arg2: i32) -> (i32, i32, i32, i32) {
    %c0_i32 = arith.constant 0 : i32
    %c0_i32_0 = arith.constant 0 : i32
    %c0_i32_1 = arith.constant 0 : i32
    return %arg0, %arg1, %c0_i32, %c0_i32_0 : i32, i32, i32, i32
  }
  func.func @transform_3(%arg0: i32, %arg1: i32, %arg2: i32) -> (i32, i32, i32, i32) {
    %c0_i32 = arith.constant 0 : i32
    %c0_i32_0 = arith.constant 0 : i32
    return %arg0, %arg1, %arg2, %c0_i32 : i32, i32, i32, i32
  }
}

module attributes {stable_mosaic.version = 11 : i64} {
  func.func @kernel(%arg0: i32, %arg1: i32, %arg2: i32, %arg3: memref<1x2x8x8xbf16, #tpu.memory_space<vmem>>, %arg4: memref<2x8x32xbf16, #tpu.memory_space<vmem>>, %arg5: memref<1x8x32xf32, #tpu.memory_space<vmem>>, %arg6: memref<8x32xf32, #tpu.memory_space<vmem>>) attributes {dimension_semantics = [#tpu.dimension_semantics<parallel>, #tpu.dimension_semantics<parallel>, #tpu.dimension_semantics<arbitrary>], iteration_bounds = array<i64: 2, 1, 2>, scalar_prefetch = 0 : i64, scratch_operands = 1 : i64, tpu.core_type = #tpu.core_type<tc>, window_params = [{transform_indices = @transform_0, window_bounds = array<i64: 1, 2, 8, 8>}, {transform_indices = @transform_1, window_bounds = array<i64: 2, 8, 32>}, {transform_indices = @transform_2, window_bounds = array<i64: 1, 8, 32>}]} {
    %c0_i32 = arith.constant 0 : i32
    %0 = arith.cmpi eq, %arg2, %c0_i32 : i32
    %1 = arith.extui %0 : i1 to i32
    %c0_i32_0 = arith.constant 0 : i32
    %2 = arith.cmpi ne, %1, %c0_i32_0 : i32
    scf.if %2 {
      %cst_19 = arith.constant 0.000000e+00 : f32
      %20 = vector.broadcast %cst_19 : f32 to vector<8x32xf32>
      %c0_20 = arith.constant 0 : index
      %c0_21 = arith.constant 0 : index
      %21 = vector.load %arg6[%c0_20, %c0_21] : memref<8x32xf32, #tpu.memory_space<vmem>>, vector<8x32xf32>
      tpu.vector_store %arg6[%c0_20, %c0_21], %20 {strides = array<i32>} : memref<8x32xf32, #tpu.memory_space<vmem>>, vector<8x32xf32>,
    } else {
    }
    %c0 = arith.constant 0 : index
    %c0_1 = arith.constant 0 : index
    %3 = vector.load %arg6[%c0, %c0_1] : memref<8x32xf32, #tpu.memory_space<vmem>>, vector<8x32xf32>
    %c0_2 = arith.constant 0 : index
    %c0_3 = arith.constant 0 : index
    %c0_4 = arith.constant 0 : index
    %c0_5 = arith.constant 0 : index
    %4 = vector.load %arg3[%c0_2, %c0_3, %c0_4, %c0_5] : memref<1x2x8x8xbf16, #tpu.memory_space<vmem>>, vector<1x1x8x8xbf16>
    %5 = vector.shape_cast %4 : vector<1x1x8x8xbf16> to vector<8x8xbf16>
    %c0_6 = arith.constant 0 : index
    %c0_7 = arith.constant 0 : index
    %c0_8 = arith.constant 0 : index
    %6 = vector.load %arg4[%c0_6, %c0_7, %c0_8] : memref<2x8x32xbf16, #tpu.memory_space<vmem>>, vector<1x8x32xbf16>
    %7 = vector.shape_cast %6 : vector<1x8x32xbf16> to vector<8x32xbf16>
    %cst = arith.constant dense<0.000000e+00> : vector<8x32xf32>
    %8 = tpu.matmul %5, %7, %cst {dimension_numbers = #tpu.dot_dimension_numbers<[1], [0], [0], [1], [0, 0, 1, 1], [], []>} : vector<8x8xbf16>, vector<8x32xbf16>, vector<8x32xf32> -> vector<8x32xf32>
    %9 = arith.addf %3, %8 : vector<8x32xf32>
    %c0_9 = arith.constant 0 : index
    %c1 = arith.constant 1 : index
    %c0_10 = arith.constant 0 : index
    %c0_11 = arith.constant 0 : index
    %10 = vector.load %arg3[%c0_9, %c1, %c0_10, %c0_11] : memref<1x2x8x8xbf16, #tpu.memory_space<vmem>>, vector<1x1x8x8xbf16>
    %11 = vector.shape_cast %10 : vector<1x1x8x8xbf16> to vector<8x8xbf16>
    %c1_12 = arith.constant 1 : index
    %c0_13 = arith.constant 0 : index
    %c0_14 = arith.constant 0 : index
    %12 = vector.load %arg4[%c1_12, %c0_13, %c0_14] : memref<2x8x32xbf16, #tpu.memory_space<vmem>>, vector<1x8x32xbf16>
    %13 = vector.shape_cast %12 : vector<1x8x32xbf16> to vector<8x32xbf16>
    %cst_15 = arith.constant dense<0.000000e+00> : vector<8x32xf32>
    %14 = tpu.matmul %11, %13, %cst_15 {dimension_numbers = #tpu.dot_dimension_numbers<[1], [0], [0], [1], [0, 0, 1, 1], [], []>} : vector<8x8xbf16>, vector<8x32xbf16>, vector<8x32xf32> -> vector<8x32xf32>
    %15 = arith.addf %9, %14 : vector<8x32xf32>
    %c0_16 = arith.constant 0 : index
    %c0_17 = arith.constant 0 : index
    %16 = vector.load %arg6[%c0_16, %c0_17] : memref<8x32xf32, #tpu.memory_space<vmem>>, vector<8x32xf32>
    tpu.vector_store %arg6[%c0_16, %c0_17], %15 {strides = array<i32>} : memref<8x32xf32, #tpu.memory_space<vmem>>, vector<8x32xf32>,
    %c1_i32 = arith.constant 1 : i32
    %17 = arith.cmpi eq, %arg2, %c1_i32 : i32
    %18 = arith.extui %17 : i1 to i32
    %c0_i32_18 = arith.constant 0 : i32
    %19 = arith.cmpi ne, %18, %c0_i32_18 : i32
    scf.if %19 {
      %c0_19 = arith.constant 0 : index
      %c0_20 = arith.constant 0 : index
      %20 = vector.load %arg6[%c0_19, %c0_20] : memref<8x32xf32, #tpu.memory_space<vmem>>, vector<8x32xf32>
      %c0_21 = arith.constant 0 : index
      %c0_22 = arith.constant 0 : index
      %c0_23 = arith.constant 0 : index
      %21 = vector.load %arg5[%c0_21, %c0_22, %c0_23] : memref<1x8x32xf32, #tpu.memory_space<vmem>>, vector<1x8x32xf32>
      %22 = vector.shape_cast %21 : vector<1x8x32xf32> to vector<8x32xf32>
      %23 = vector.shape_cast %20 : vector<8x32xf32> to vector<1x8x32xf32>
      tpu.vector_store %arg5[%c0_21, %c0_22, %c0_23], %23 {strides = array<i32>} : memref<1x8x32xf32, #tpu.memory_space<vmem>>, vector<1x8x32xf32>,
    } else {
    }
    return
  }
  func.func @transform_0(%arg0: i32, %arg1: i32, %arg2: i32) -> (i32, i32, i32, i32) {
    %c0_i32 = arith.constant 0 : i32
    %c0_i32_0 = arith.constant 0 : i32
    return %arg0, %arg2, %arg1, %c0_i32 : i32, i32, i32, i32
  }
  func.func @transform_1(%arg0: i32, %arg1: i32, %arg2: i32) -> (i32, i32, i32) {
    %c0_i32 = arith.constant 0 : i32
    %c0_i32_0 = arith.constant 0 : i32
    %c0_i32_1 = arith.constant 0 : i32
    return %arg2, %c0_i32, %c0_i32_0 : i32, i32, i32
  }
  func.func @transform_2(%arg0: i32, %arg1: i32, %arg2: i32) -> (i32, i32, i32) {
    %c0_i32 = arith.constant 0 : i32
    %c0_i32_0 = arith.constant 0 : i32
    return %arg0, %arg1, %c0_i32 : i32, i32, i32
  }
}

</mosaic_0001>

<bundles_post_ra>
// kernel: _attention_forward.3
= control target key start
LH: loop header
LB: loop body
LE: loop exit
PB: predicated region body
PF: predicated region fallthrough
CT: control target
= control target key end

     0   :  { %s1229_s27 = smov 0   ;;  %s1231_s28 = smov 0   ;;  %s1348_s0 = inlined_call_operand.vmem [shape: bf16[2,8,32], index: 0, kind: input, shape index: {}]   ;;  %s1349_s1 = inlined_call_operand.vmem [shape: f32[8,8], index: 1, kind: input, shape index: {}]   ;;  %s1350_s2 = inlined_call_operand.vmem [shape: f32[8,8], index: 2, kind: input, shape index: {}]   ;;  %s1351_s3 = inlined_call_operand.vmem [shape: bf16[2,32,16], index: 3, kind: input, shape index: {}]   ;;  %s1352_s4 = inlined_call_operand.vmem [shape: bf16[2,32,8], index: 4, kind: input, shape index: {}]   ;;  %s1353_s5 = inlined_call_operand.vmem [shape: bf16[2,32,8], index: 5, kind: input, shape index: {}]   ;;  %s1354_s6 = inlined_call_operand.vmem [shape: bf16[2,4,8,8], index: 6, kind: output, shape index: {0}]   ;;  %s1355_s7 = inlined_call_operand.vmem [shape: bf16[2,2,8,8], index: 7, kind: output, shape index: {1}]   ;;  %s1356_s8 = inlined_call_operand.vmem [shape: bf16[2,2,8,8], index: 8, kind: output, shape index: {2}]  }
   0x1   :  { %s1233_s29 = smov 0   ;;  %s1235_s30 = smov 0  }
   0x2   :  { %s1237_s9 = smov 0  }
   0x3 LB: > { %s34_s10 = sadd.s32 1, %s1167_s29  ;;  %s38_s11 = sadd.s32 1, %s1171_s30  ;;  %s1175_s9 = sphi %s1237_s9, %s19_s9   ;;  %s1171_s30 = sphi %s1235_s30, %s1360_s30   ;;  %s1167_s29 = sphi %s1233_s29, %s1359_s29   ;;  %s1163_s28 = sphi %s1231_s28, %s1358_s28   ;;  %s1159_s27 = sphi %s1229_s27, %s1357_s27  }
   0x4   : > { %p36_p0 = scmp.ge.s32.totalorder %s34_s10, 2  ;;  %p1019_p1 = scmp.ge.s32.totalorder %s1175_s9, 1 }
   0x5   : > { %p350_p2 = scmp.lt.s32.totalorder %s1175_s9, 5 }
   0x6   : > { %s1362_s10 = smov (%p36_p0, %s34_s10), 0  ;;  %s1364_s11 = smov (!%p36_p0, %s38_s11), %s1171_s30 }
   0x7   : > { %p351_p3 = pnand %p1019_p1, %p350_p2  ;;  %p40_p4 = scmp.ge.s32.totalorder %s1364_s11, 2 }
   0x8   : > { %p453_p5 = scmp.lt.s32.totalorder (!%p351_p3), %s1163_s28, 1  ;;  %p438_p6 = scmp.lt.s32.totalorder (!%p351_p3), %s1159_s27, 1  ;;  %v1265_v0 = vld [vmem:[%s1350_s2] sm:$0xff] (!%p351_p3)  ;;  %v1177_v1 = vmov (!%p351_p3), 0.0   ;;  %vm1178_vm0 = vmmov (!%p351_p3), 0   ;;  %vm523_vm1 = vcmask (!%p351_p3), 261120  }
   0x9   : > { %s1366_s11 = smov (%p40_p4, %s1364_s11), 0  ;;  %354 = sbr.rel (%p351_p3) target bundleno = 605 (0x25d), region = 44 }
   0xa   : > { %1060 = vmatprep.subr.bf16.mxu0 (!%p351_p3), %v1177_v1  ;;  %1064 = vmatprep.mubr.msk.bf16.mxu0 (!%p351_p3), %vm1178_vm0, %v1177_v1  ;;  %s1179_s15 = smov (!%p351_p3), 8   ;;  %s1180_s12 = smov (!%p351_p3), 124   ;;  %vm631_vm2 = vcmask (!%p351_p3), 31744   ;;  %v505_v18 = vld [vmem:[%s1349_s1] sm:$0xff] (!%p351_p3)  ;;  %vm636_vm3 = vcmask (!%p351_p3), 60416  }
   0xb   : > { %710 = vrot.lane.b32.xlu1 (!%p351_p3), %v1265_v0, %s1179_s15  ;;  %1068 = vmatprep.subr.bf16.mxu1 (!%p351_p3), %v1177_v1  ;;  %s1182_s21 = smov (!%p351_p3), 4   ;;  %s1027_s22 = sshll.u32 (!%p351_p3), %s1163_s28, 1 }
   0xc   : > { %1072 = vmatprep.mubr.msk.bf16.mxu1 (!%p351_p3), %vm1178_vm0, %v1177_v1  ;;  %p471_p7 = scmp.lt.s32.totalorder (!%p351_p3), %s1027_s22, 3 }
  0x10   : > { %s1269_s14 = scalar_select %p453_p5, %s1163_s28, 1 }
  0x11   : > { %s1368_s27 = smov (!%p438_p6, %s1159_s27), 1  ;;  %s1370_s22 = smov (!%p471_p7, %s1027_s22), 3 }
  0x12   : > { %s1277_s16 = sshll.u32 %s1269_s14, 4  ;;  %s1020_s20 = sshll.u32 %s1368_s27, 2 }
  0x13   : > { %s462_s19 = scalar_lea.vmem %s1352_s4, %s1277_s16  ;;  %s457_s23 = scalar_lea.vmem %s1351_s3, %s1277_s16 }
  0x14   : > { %v1131_v2 = vld [vmem:[%s462_s19] sm:$0xff]   ;;  %v1132_v3 = vld [vmem:[%s462_s19 + $0x8] sm:$0xff]   ;;  %s444_s26 = scalar_lea.vmem %s1348_s0, %s1020_s20  ;;  %s467_s18 = scalar_lea.vmem %s1353_s5, %s1277_s16 }
  0x15   : > { %1061 = vmatpush3.bf16.msra.mxu0 %v1131_v2  ;;  %v504_v4 = vld [vmem:[%s444_s26] sm:$0xf]  ;;  %v1134_v6 = vld [vmem:[%s457_s23 + $0x8] sm:$0xff]   ;;  %s1181_s19 = smov 116   ;;  %s477_s24 = sadd.s32 %s1020_s20, %s1370_s22 }
  0x16   : > { %1062 = vmatprep.subr.bf16.mxu0 %v1177_v1  ;;  %v1133_v5 = vld [vmem:[%s457_s23] sm:$0xff]   ;;  %v1136_v16 = vld [vmem:[%s467_s18 + $0x8] sm:$0xff]   ;;  %s1029_s28 = sshll.u32 %s477_s24, 2 }
  0x17   : > { %v1135_v15 = vld [vmem:[%s467_s18] sm:$0xff]  }
  0x18   : > { %1069 = vmatpush3.bf16.msra.mxu1 %v1135_v15 }
  0x19   : > { %1063 = vmatpush3.bf16.msra.mxu0 %v1132_v3  ;;  %1070 = vmatprep.subr.bf16.mxu1 %v1177_v1 }
  0x1a   : > { %1076 = vmatprep.subr.bf16.mxu0 %v1177_v1 }
  0x1c   : > { %1065 = vmatmul.mubr.msk.bf16.vlgmr.msra.gmra.mrb[0].mxu0 %vm523_vm1, %v504_v4  ;;  %1071 = vmatpush3.bf16.msra.mxu1 %v1136_v16 }
  0x1d   : > { %1077 = vmatpush3.bf16.msra.mxu0 %v1133_v5  ;;  %1080 = vmatprep.mubr.msk.bf16.mxu0 %vm1178_vm0, %v1177_v1 }
  0x1e   : > { %1078 = vmatprep.subr.bf16.mxu0 %v1177_v1 }
  0x1f   : > { %1073 = vmatmul.mubr.msk.bf16.vlgmr.msra.gmra.mrb[0].mxu1 %vm523_vm1, %v504_v4 }
  0x21   : > { %1079 = vmatpush3.bf16.msra.mxu0 %v1134_v6 }
  0x24   : > { %1081 = vmatmul.mubr.msk.bf16.vlgmr.msra.gmra.mrb[4].mxu0 %vm523_vm1, %v504_v4 }
  0x7d   : > { %v711_v34 = vpop.permute.xlu1 %710 }
  0xef   : > { %v1296_v7 = vpop.f32.mrb[0].mxu0 }
  0xf0   : > { %v1066_v8 = vpop.f32.mrb[1].mxu0  ;;  %v623_v41 = vmul.f32 %v1296_v7, %v1265_v0 }
  0xf1   : > { %v564_v9 = vpop.f32.mrb[2].mxu0 }
  0xf2   : > { %v1067_v10 = vpop.f32.mrb[3].mxu0  ;;  %v617_v29 = vpop.f32.mrb[0].mxu1 }
  0xf3   : > { %v638_v30 = vpack.c.bf16 %v617_v29, %v617_v29  ;;  %v1074_v31 = vpop.f32.mrb[1].mxu1 }
  0xf4   : > { %v620_v32 = vpop.f32.mrb[2].mxu1 }
  0xf5   : > { %v1075_v33 = vpop.f32.mrb[3].mxu1 }
  0xf7   : > { %v690_v11 = vpop.f32.mrb[4].mxu0 }
  0xf8   : > { %698 = vrot.lane.b32.xlu0 %v690_v11, %s1180_s12  ;;  %v1082_v12 = vpop.f32.mrb[5].mxu0  ;;  %v696_v25 = vmul.f32 %v690_v11, %v1265_v0  ;;  %v713_v35 = vmul.f32 %v711_v34, %v690_v11 }
  0xf9   : > { %v693_v13 = vpop.f32.mrb[6].mxu0 }
  0xfa   : > { %v1083_v14 = vpop.f32.mrb[7].mxu0 }
  0xfc   : > { %714 = vrot.lane.b32.xlu0 %v690_v11, %s1181_s19 }
 0x100   : > { %625 = vrot.lane.b32.xlu0 %v1296_v7, %s1180_s12  ;;  %s479_s12 = scalar_lea.vmem %s1354_s6, %s1029_s28 }
 0x104   : > { %701 = vrot.lane.b32.xlu0 %v690_v11, %s1182_s21 }
 0x16a   : > { %v699_v17 = vpop.permute.xlu0 %698 }
 0x16e   : > { %v715_v19 = vpop.permute.xlu0 %714 }
 0x16f   : > { %v717_v20 = vsel %vm631_vm2, %v715_v19, %v699_v17 }
 0x170   : > { %v718_v21 = vmul.f32 %v717_v20, %v505_v18 }
 0x172   : > { %720 = vrot.lane.b32.xlu1 %v718_v21, %s1179_s15  ;;  %v626_v22 = vpop.permute.xlu0 %625  ;;  %s1030_s15 = sshll.u32 %s1368_s27, 1  ;;  %s1183_s27 = smov 120  }
 0x173   : > { %s489_s20 = sadd.s32 %s1030_s15, %s1269_s14 }
 0x174   : > { %s1031_s13 = sshll.u32 %s489_s20, 2 }
 0x175   : > { %s502_s19 = scalar_lea.vmem %s1356_s8, %s1031_s13  ;;  %s491_s22 = scalar_lea.vmem %s1355_s7, %s1031_s13 }
 0x176   : > { %628 = vrot.lane.b32.xlu1 %v1296_v7, %s1182_s21  ;;  %v702_v23 = vpop.permute.xlu0 %701  ;;  %639 = vst.msk [vmem:[%s502_s19] sm:$0xf] %vm636_vm3, %v638_v30 }
 0x177   : > { %v704_v24 = vsel %vm631_vm2, %v699_v17, %v702_v23 }
 0x178   : > { %v705_v26 = vmul.f32 %v704_v24, %v505_v18 }
 0x17a   : > { %v706_v27 = vadd.f32 %v705_v26, %v696_v25 }
 0x17c   : > { %v707_v28 = vpack.c.bf16 %v706_v27, %v706_v27 }
 0x17e   : > { %708 = vst.msk [vmem:[%s479_s12] sm:$0xf] %vm636_vm3, %v707_v28 }
 0x1e4   : > { %v721_v36 = vpop.permute.xlu1 %720 }
 0x1e5   : > { %v723_v37 = vadd.f32 %v721_v36, %v713_v35 }
 0x1e7   : > { %v1050_v38 = vpack.c.bf16 %v723_v37, %v723_v37 }
 0x1e8   : > { %v629_v39 = vpop.permute.xlu1 %628 }
 0x1e9   : > { %v632_v40 = vsel %vm631_vm2, %v626_v22, %v629_v39  ;;  %728 = vrot.lane.b32.xlu1 %v1050_v38, %s1183_s27 }
 0x1ea   : > { %v633_v42 = vmul.f32 %v632_v40, %v505_v18 }
 0x1ec   : > { %v634_v43 = vadd.f32 %v633_v42, %v623_v41 }
 0x1ee   : > { %v635_v44 = vpack.c.bf16 %v634_v43, %v634_v43 }
 0x1f0   : > { %637 = vst.msk [vmem:[%s491_s22] sm:$0xf] %vm636_vm3, %v635_v44 }
 0x25b   : > { %v729_v45 = vpop.permute.xlu1 %728 }
 0x25c   : > { %1044 = vst.msk [vmem:[%s479_s12 + $0x4] sm:$0xf] %vm636_vm3, %v729_v45 }
 0x25d PF: > { %s19_s9 = sadd.s32 1, %s1175_s9   ;;  %s1357_s27 = smov %s1167_s29 }
 0x25e   : > { %p16_p8 = scmp.ge.s32.totalorder %s19_s9, 6   ;;  %s1358_s28 = smov %s1171_s30 }
 0x25f   : > { %s1359_s29 = smov %s1362_s10  ;;  %s1360_s30 = smov %s1366_s11 }
 0x260   :  { %18 = sbr.rel (!%p16_p8) target bundleno = 3 (0x3), region = 114 }

// kernel: _attention_forward.5
= control target key start
LH: loop header
LB: loop body
LE: loop exit
PB: predicated region body
PF: predicated region fallthrough
CT: control target
= control target key end

     0   :  { %7 = vsyncpa [#allocation4], 0  ;;  %s811_s0 = inlined_call_operand.vmem [shape: bf16[2,4,8,8], index: 0, kind: input, shape index: {}]   ;;  %s812_s1 = inlined_call_operand.vmem [shape: bf16[4,8,32], index: 1, kind: input, shape index: {}]   ;;  %s813_s2 = inlined_call_operand.hbm [shape: f32[2,8,32], index: 2, kind: output, shape index: {}]  }
   0x1   :  { %9 = vsyncpa [#allocation4 + $0x1], 0  ;;  %s668_s9 = smov 0   ;;  %s670_s10 = smov 0  }
   0x2   :  { %s672_s11 = smov 0   ;;  %s674_s12 = smov 0  }
   0x3   :  { %s676_s13 = smov 0   ;;  %s678_s14 = smov 0  }
   0x4   :  { %s680_s15 = smov 0   ;;  %s682_s16 = smov 0  }
   0x5 LB: > { %s440_s17 = sadd.s32 4294967295, %s647_s16   ;;  %s441_s18 = sadd.s32 4294967294, %s647_s16   ;;  %s647_s16 = sphi %s682_s16, %s15_s16   ;;  %s643_s15 = sphi %s680_s15, %s822_s15   ;;  %s639_s14 = sphi %s678_s14, %s821_s14   ;;  %s635_s13 = sphi %s676_s13, %s820_s13   ;;  %s631_s12 = sphi %s674_s12, %s819_s12   ;;  %s627_s11 = sphi %s672_s11, %s818_s11   ;;  %s623_s10 = sphi %s670_s10, %s817_s10   ;;  %s619_s9 = sphi %s668_s9, %s816_s9  }
   0x6   : > { %s27_s19 = sadd.s32 1, %s639_s14  ;;  %s34_s20 = sadd.s32 1, %s643_s15 }
   0x7   : > { %p28_p0 = scmp.ge.s32.totalorder %s27_s19, 2  ;;  %p109_p1 = scmp.ne.s32.totalorder %s627_s11, %s623_s10 }
   0x8   : > { %p110_p2 = scmp.eq.s32.totalorder %s440_s17, 3  ;;  %p115_p4 = scmp.ne.s32.totalorder %s623_s10, %s619_s9 }
   0x9   : > { %s824_s19 = smov (%p28_p0, %s27_s19), 0  ;;  %s826_s20 = smov (!%p28_p0, %s34_s20), %s643_s15 }
   0xa   : > { %p717_p3 = por %p110_p2, %p109_p1  ;;  %p36_p5 = scmp.ge.s32.totalorder %s826_s20, 2 }
   0xb   : > { %p116_p6 = scmp.eq.s32.totalorder %s441_s18, 3  ;;  %p444_p7 = scmp.ge.s32.totalorder %s647_s16, 1 }
   0xc   : > { %p159_p8 = scmp.lt.s32.totalorder %s647_s16, 5  ;;  %s828_s20 = smov (%p36_p5, %s826_s20), 0 }
   0xd   : > { %p727_p9 = por %p116_p6, %p115_p4  ;;  %s94_s23 = ssub.s32 %s643_s15, %s828_s20 }
   0xe   : > { %p160_p10 = pnand %p444_p7, %p159_p8  ;;  %s99_s24 = sadd.s32 1, %s627_s11 }
   0xf   : > { %p97_p11 = scmp.eq.s32.totalorder %s94_s23, 0  ;;  %s190_s26 = sand.u32 (!%p160_p10), 1, %s623_s10  }
  0x10   : > { %163 = sbr.rel (%p160_p10) target bundleno = 285 (0x11d), region = 28  ;;  %s446_s27 = sshll.u32 (!%p160_p10), %s631_s12, 1 }
  0x11   : > { %s735_s25 = scalar_select %p97_p11, %s627_s11, %s99_s24  }
  0x12   : > { %s741_s28 = sshll.u32 (!%p160_p10), %s190_s26, 3  ;;  %p194_p12 = scmp.lt.s32.totalorder (!%p160_p10), %s635_s13, 1 }
  0x13   : > { %p196_p13 = scmp.lt.s32.totalorder (!%p160_p10), %s446_s27, 3  ;;  %s192_s24 = scalar_lea.vmem (!%p160_p10), [#allocation3], %s741_s28 }
  0x14   : > { %p451_p0 = scmp.ne.s32.totalorder (!%p160_p10), %s631_s12, 0 }
  0x17   : > { %s195_s29 = scalar_select %p194_p12, %s635_s13, 1 }
  0x18   : > { %s830_s27 = smov (!%p196_p13, %s446_s27), 3  ;;  %216 = sbr.rel (%p451_p0) target bundleno = 31 (0x1f), region = 32 }
  0x19   : > { %s447_s30 = sshll.u32 %s195_s29, 2  ;;  %s450_s4 = sshll.u32 %s830_s27, 2  ;;  %vm217_vm0 = vcmask (!%p451_p0), 261120   ;;  %v649_v0 = vmov (!%p451_p0), 0.0  }
  0x1a   : > { %s202_s3 = sadd.s32 %s447_s30, %s830_s27  ;;  %s210_s8 = scalar_lea.vmem %s812_s1, %s450_s4  ;;  %218 = vst.msk [vmem:[#allocation2] sm:$0xff] (!%p451_p0), %vm217_vm0, %v649_v0 }
  0x1b   : > { %s448_s5 = sshll.u32 %s202_s3, 2 }
  0x1c   : > { %s204_s23 = scalar_lea.vmem %s811_s0, %s448_s5 }
  0x1f PF: > { %v221_v1 = vld [vmem:[%s210_s8] sm:$0xf]  ;;  %vm226_vm1 = vcmask 1043456   ;;  %v454_v2 = vld [vmem:[%s210_s8 + $0x4] sm:$0xf]  ;;  %v650_v3 = vmov 0.0  }
  0x20   : > { %465 = vmatprep.subr.bf16.mxu1 %v650_v3  ;;  %471 = vmatprep.subr.bf16.mxu0 %v650_v3  ;;  %v228_v4 = vsel %vm226_vm1, %v221_v1, 0  ;;  %v279_v5 = vsel %vm226_vm1, %v454_v2, 0  ;;  %v220_v6 = vld [vmem:[%s204_s23] sm:$0xf]  ;;  %vm222_vm2 = vcmask 64512   ;;  %vm651_vm3 = vmmov 0  }
  0x21   : > { %466 = vmatpush3.bf16.msra.mxu1 %v228_v4  ;;  %472 = vmatpush3.bf16.msra.mxu0 %v279_v5  ;;  %v453_v7 = vld [vmem:[%s204_s23 + $0x4] sm:$0xf]  ;;  %vm322_vm4 = vcmask 261120   ;;  %p456_p1 = scmp.ne.s32.totalorder %s631_s12, 1 }
  0x22   : > { %467 = vmatprep.mubr.msk.bf16.mxu1 %vm651_vm3, %v650_v3  ;;  %473 = vmatprep.mubr.msk.bf16.mxu0 %vm651_vm3, %v650_v3  ;;  %v219_v8 = vld [vmem:[#allocation2] sm:$0xff] }
  0x24   : > { %468 = vmatmul.mubr.msk.bf16.vlgmr.msra.gmra.mrb[0].mxu1 %vm222_vm2, %v220_v6  ;;  %474 = vmatmul.mubr.msk.bf16.vlgmr.msra.gmra.mrb[0].mxu0 %vm222_vm2, %v453_v7 }
  0xf6   : > { %327 = sbr.rel (%p456_p1) target bundleno = 261 (0x105), region = 36 }
  0xf7   : > { %v264_v9 = vpop.f32.mrb[0].mxu1  ;;  %v315_v10 = vpop.f32.mrb[0].mxu0 }
  0xf8   : > { %v270_v11 = vadd.f32 %v264_v9, %v219_v8  ;;  %v469_v12 = vpop.f32.mrb[1].mxu1  ;;  %v475_v13 = vpop.f32.mrb[1].mxu0 }
  0xf9   : > { %v267_v14 = vpop.f32.mrb[2].mxu1  ;;  %v318_v15 = vpop.f32.mrb[2].mxu0 }
  0xfa   : > { %v321_v16 = vadd.f32 %v315_v10, %v270_v11  ;;  %v470_v17 = vpop.f32.mrb[3].mxu1  ;;  %v476_v18 = vpop.f32.mrb[3].mxu0 }
  0xfc   : > { %323 = vst.msk [vmem:[#allocation2] sm:$0xff] %vm322_vm4, %v321_v16 }
 0x103   : > { %v328_v19 = vld [vmem:[#allocation2] sm:$0xff] }
 0x104   : > { %329 = vst.msk [vmem:[%s192_s24] sm:$0xff] %vm322_vm4, %v328_v19 }
 0x105 PF: > { %s458_s27 = sshll.u32 %s635_s13, 7  ;;  %s345_s4 = sshll.u32 %s192_s24, 4  ;;  %s346_s4 = int_to_ptr.vmem [resolvable:$true] %s345_s4 }
 0x106   : > { %s760_s3 = scalar_lea.hbm %s813_s2, %s458_s27  ;;  %s331_s12 = scalar_lea.sflag [#allocation4], %s190_s26 }
 0x107   : > { %s553_s5 = scalar_lea.vmem %s346_s4, 128  ;;  %s652_s6 = smov [#allocation3]  }
 0x108   : > { %p554_p2 = scmp.ne.s32.totalorder %s346_s4, %s553_s5  ;;  %s557_s7 = sshll.u32 %s652_s6, 4  ;;  %s558_s7 = int_to_ptr.vmem [resolvable:$false] %s557_s7 }
 0x109   : > { %s559_s8 = scalar_lea.vmem %s558_s7, 256  ;;  %p560_p6 = scmp.lt.s32.totalorder %s346_s4, %s558_s7 }
 0x10a   : > { %p555_p4 = pnand %p554_p2, %p717_p3  ;;  %p561_p7 = scmp.lt.s32.totalorder %s559_s8, %s553_s5 }
 0x10c   : > { %p556_p5 = pneg %p555_p4  ;;  %p562_p8 = por %p561_p7, %p560_p6 }
 0x10e   : > { %p563_p10 = pnand %p562_p8, %p556_p5 }
 0x110   : > { %566 = shalt.err (!%p563_p10)
}
 0x111   : > { %s567_s13 = scalar_lea.hbm %s760_s3, 128  ;;  %s571_s17 = scalar_lea.hbm %s813_s2, 256 }
 0x112   : > { %p568_p11 = scmp.ne.s32.totalorder %s760_s3, %s567_s13  ;;  %p572_p0 = scmp.lt.u32.totalorder %s760_s3, %s813_s2 }
 0x113   : > { %p573_p1 = scmp.lt.u32.totalorder %s571_s17, %s567_s13  ;;  %p575_p4 = scmp.lt.u32.totalorder %s567_s13, %s760_s3 }
 0x114   : > { %p569_p12 = pnand %p568_p11, %p717_p3 }
 0x115   : > { %p574_p2 = por %p573_p1, %p572_p0 }
 0x116   : > { %p570_p13 = pneg %p569_p12 }
 0x117   : > { %p576_p5 = por %p575_p4, %p574_p2 }
 0x119   : > { %p577_p6 = pnand %p576_p5, %p570_p13 }
 0x11b   : > { %580 = shalt.err (!%p577_p6)
}
 0x11c   : > { %479 = dma.vmem_to_hbm [thread:$0]  (%p717_p3), %s346_s4, 128, %s760_s3, %s331_s12  }
 0x11d PF: > { %p485_p7 = scmp.ge.s32.totalorder %s647_s16, 2  ;;  %s357_s24 = sand.u32 1, %s619_s9  }
 0x11e   : > { %s358_s27 = scalar_lea.sflag [#allocation4], %s357_s24 }
 0x11f   : > { %p482_p8 = pnand %p485_p7, %p727_p9 }
 0x121   : > { %614 = dma.done.wait (!%p482_p8), %s358_s27, 128  }
 0x122   : > { %616 = vsyncadd (!%p482_p8), %s358_s27, 4294967168  ;;  %s15_s16 = sadd.s32 1, %s647_s16   ;;  %s816_s9 = smov %s623_s10 }
 0x123   : > { %p12_p10 = scmp.ge.s32.totalorder %s15_s16, 6   ;;  %s817_s10 = smov %s627_s11 }
 0x124   : > { %s818_s11 = smov %s735_s25  ;;  %s819_s12 = smov %s639_s14 }
 0x125   : > { %s820_s13 = smov %s643_s15  ;;  %s821_s14 = smov %s824_s19 }
 0x126   : > { %s822_s15 = smov %s828_s20  ;;  %14 = sbr.rel (!%p12_p10) target bundleno = 5 (0x5), region = 76 }
 0x12d   :  { %363 = vsyncpa [#allocation4], 1 }
 0x12e   :  { %365 = vsyncpa [#allocation4 + $0x1], 1 }

// kernel: _attention_forward.4
= control target key start
LH: loop header
LB: loop body
LE: loop exit
PB: predicated region body
PF: predicated region fallthrough
CT: control target
= control target key end

     0   :  { %s1043_s12 = smov 0   ;;  %s1045_s13 = smov 0   ;;  %s1138_s0 = inlined_call_operand.vmem [shape: bf16[2,4,8,8], index: 0, kind: input, shape index: {}]   ;;  %s1139_s1 = inlined_call_operand.vmem [shape: bf16[2,2,8,8], index: 1, kind: input, shape index: {}]   ;;  %s1140_s2 = inlined_call_operand.vmem [shape: bf16[2,2,8,8], index: 2, kind: input, shape index: {}]   ;;  %s1141_s3 = inlined_call_operand.vmem [shape: bf16[2,4,8,8], index: 3, kind: output, shape index: {}]  }
   0x1   :  { %s1047_s14 = smov 0   ;;  %s1049_s15 = smov 0  }
   0x2   :  { %s1051_s16 = smov 0  }
   0x3 LB: > { %s28_s17 = sadd.s32 1, %s1009_s14  ;;  %s32_s18 = sadd.s32 1, %s1013_s15  ;;  %s1017_s16 = sphi %s1051_s16, %s13_s16   ;;  %s1013_s15 = sphi %s1049_s15, %s1145_s15   ;;  %s1009_s14 = sphi %s1047_s14, %s1144_s14   ;;  %s1005_s13 = sphi %s1045_s13, %s1143_s13   ;;  %s1001_s12 = sphi %s1043_s12, %s1142_s12  }
   0x4   : > { %p30_p0 = scmp.ge.s32.totalorder %s28_s17, 2  ;;  %p882_p1 = scmp.ge.s32.totalorder %s1017_s16, 1 }
   0x5   : > { %p202_p2 = scmp.lt.s32.totalorder %s1017_s16, 5 }
   0x6   : > { %s1147_s17 = smov (%p30_p0, %s28_s17), 0  ;;  %s1149_s18 = smov (!%p30_p0, %s32_s18), %s1013_s15 }
   0x7   : > { %p203_p3 = pnand %p882_p1, %p202_p2  ;;  %p34_p4 = scmp.ge.s32.totalorder %s1149_s18, 2 }
   0x8   : > { %s883_s19 = sshll.u32 (!%p203_p3), %s1001_s12, 1  ;;  %p257_p5 = scmp.lt.s32.totalorder (!%p203_p3), %s1005_s13, 1  ;;  %vm306_vm0 = vcmask (!%p203_p3), 64512   ;;  %v1019_v0 = vmov (!%p203_p3), 0.0   ;;  %vm1020_vm1 = vmmov (!%p203_p3), 0   ;;  %vm301_vm2 = vcmask (!%p203_p3), 7168  }
   0x9   : > { %s1151_s18 = smov (%p34_p4, %s1149_s18), 0  ;;  %206 = sbr.rel (%p203_p3) target bundleno = 833 (0x341), region = 32 }
   0xa   : > { %908 = vmatprep.subr.bf16.mxu0 (!%p203_p3), %v1019_v0  ;;  %p259_p6 = scmp.lt.s32.totalorder (!%p203_p3), %s883_s19, 3  ;;  %p271_p7 = scmp.lt.s32.totalorder (!%p203_p3), %s1001_s12, 1  ;;  %307 = vst.msk [vmem:[#allocation4] sm:$0xff] (!%p203_p3), %vm306_vm0, %v1019_v0  ;;  %308 = vst.msk [vmem:[#allocation4 + $0x8] sm:$0xff] (!%p203_p3), %vm306_vm0, %v1019_v0  ;;  %910 = vmatprep.mubr.msk.bf16.mxu0 (!%p203_p3), %vm1020_vm1, %v1019_v0  ;;  %v1021_v4 = vmov (!%p203_p3), -inf   ;;  %v552_v5 = vlaneseq (!%p203_p3)  ;;  %v1022_v19 = vmov (!%p203_p3), 0  }
   0xb   : > { %914 = vmatprep.subr.bf16.mxu1 (!%p203_p3), %v1019_v0  ;;  %916 = vmatprep.mubr.msk.bf16.mxu1 (!%p203_p3), %vm1020_vm1, %v1019_v0  ;;  %302 = vst.msk [vmem:[#allocation2] sm:$0xff] (!%p203_p3), %vm301_vm2, %v1021_v4  ;;  %303 = vst.msk [vmem:[#allocation2 + $0x8] sm:$0xff] (!%p203_p3), %vm301_vm2, %v1021_v4  ;;  %vm649_vm5 = vcmask (!%p203_p3), 1043456   ;;  %vm720_vm6 = vcmask (!%p203_p3), 60416  }
   0xc   : > { %304 = vst.msk [vmem:[#allocation3] sm:$0xff] (!%p203_p3), %vm301_vm2, %v1019_v0  ;;  %305 = vst.msk [vmem:[#allocation3 + $0x8] sm:$0xff] (!%p203_p3), %vm301_vm2, %v1019_v0  ;;  %v553_v6 = vshrl.u32 (!%p203_p3), %v552_v5, 7  ;;  %v580_v9 = vand.u32 (!%p203_p3), 127, %v552_v5  ;;  %964 = vset.pattern.permute.xlu1 (!%p203_p3), %v1022_v19  ;;  %965 = vset.pattern.permute.xlu0 (!%p203_p3), %v1022_v19 }
   0xe   : > { %v554_v7 = vadd.s32 (!%p203_p3), 8, %v553_v6  ;;  %v559_v8 = vand.u32 (!%p203_p3), 7, %v553_v6 }
  0x10   : > { %s1153_s13 = smov (!%p257_p5, %s1005_s13), 1  ;;  %s1155_s19 = smov (!%p259_p6, %s883_s19), 3  ;;  %v566_v10 = vand.u32 7, %v554_v7  ;;  %vm581_vm3 = vcmp.le.s32.totalorder %v580_v9, %v559_v8 }
  0x11   : > { %s884_s20 = sshll.u32 %s1153_s13, 2  ;;  %s886_s23 = sshll.u32 %s1153_s13, 1  ;;  %v631_v57 = vld [vmem:[#allocation4] sm:$0xff]  ;;  %v632_v59 = vld [vmem:[#allocation4 + $0x8] sm:$0xff] }
  0x12   : > { %s1079_s21 = sadd.s32 %s884_s20, %s1155_s19  ;;  %s1157_s12 = smov (!%p271_p7, %s1001_s12), 1  ;;  %vm582_vm4 = vcmp.le.s32.totalorder %v580_v9, %v566_v10  ;;  %v585_v20 = vld [vmem:[#allocation2] sm:$0xff]  ;;  %v586_v23 = vld [vmem:[#allocation2 + $0x8] sm:$0xff] }
  0x13   : > { %s885_s22 = sshll.u32 %s1079_s21, 2  ;;  %s1088_s27 = sadd.s32 %s886_s23, %s1157_s12  ;;  %v617_v45 = vld [vmem:[#allocation3] sm:$0xff]  ;;  %v618_v48 = vld [vmem:[#allocation3 + $0x8] sm:$0xff] }
  0x14   : > { %s267_s26 = scalar_lea.vmem %s1138_s0, %s885_s22  ;;  %s887_s28 = sshll.u32 %s1088_s27, 2 }
  0x15   : > { %s276_s4 = scalar_lea.vmem %s1139_s1, %s887_s28  ;;  %v966_v3 = vld [vmem:[%s267_s26] sm:$0xff]   ;;  %s284_s7 = scalar_lea.vmem %s1140_s2, %s887_s28 }
  0x16   : > { %v496_v1 = vld [vmem:[%s276_s4] sm:$0xf]  ;;  %s296_s10 = scalar_lea.vmem %s1141_s3, %s885_s22 }
  0x17   : > { %v509_v2 = vsel %vm306_vm0, %v496_v1, 0  ;;  %v499_v28 = vld [vmem:[%s284_s7] sm:$0xf] }
  0x18   : > { %909 = vmatpush3.bf16.xpose.msra.mxu0 %v509_v2  ;;  %v651_v29 = vsel %vm649_vm5, %v499_v28, 0 }
  0x19   : > { %915 = vmatpush3.bf16.msra.mxu1 %v651_v29 }
  0x1f   : > { %911 = vmatmul.mubr.msk.bf16.vlgmr.msra.gmra.mrb[0].mxu0 %vm306_vm0, %v966_v3 }
  0xf2   : > { %v545_v11 = vpop.f32.mrb[0].mxu0 }
  0xf3   : > { %v583_v12 = vsel %vm581_vm3, %v545_v11, -inf  ;;  %v912_v13 = vpop.f32.mrb[1].mxu0 }
  0xf4   : > { %v548_v14 = vpop.f32.mrb[2].mxu0  ;;  %v587_v15 = vsel %vm306_vm0, %v583_v12, -inf }
  0xf5   : > { %v584_v16 = vsel %vm582_vm4, %v548_v14, -inf  ;;  %588 = vmax.xlane.f32.xlu0 %v587_v15  ;;  %v913_v17 = vpop.f32.mrb[3].mxu0 }
  0xf6   : > { %v590_v18 = vsel %vm306_vm0, %v584_v16, -inf }
  0xf9   : > { %591 = vmax.xlane.f32.xlu0 %v590_v18 }
 0x182   : > { %v589_v21 = vpop.xlane.xlu0 %588 }
 0x183   : > { %v593_v22 = vmax.f32 %v585_v20, %v589_v21 }
 0x185   : > { %v595_v24 = vsub.f32 %v585_v20, %v593_v22  ;;  %698 = vst.msk [vmem:[#allocation2] sm:$0xff] %vm301_vm2, %v593_v22  ;;  %603 = vperm.xlu1 %964, %v593_v22  }
 0x186   : > { %v592_v25 = vpop.xlane.xlu0 %591 }
 0x187   : > { %v594_v26 = vmax.f32 %v586_v23, %v592_v25  ;;  %v597_v42 = vmul.f32 1.442695, %v595_v24 }
 0x189   : > { %v596_v27 = vsub.f32 %v586_v23, %v594_v26  ;;  %699 = vst.msk [vmem:[#allocation2 + $0x8] sm:$0xff] %vm301_vm2, %v594_v26  ;;  %608 = vperm.xlu1 %964, %v594_v26  }
 0x18b   : > { %v599_v41 = vmul.f32 1.442695, %v596_v27 }
 0x204   : > { %v604_v30 = vpop.permute.xlu1 %603 }
 0x205   : > { %v611_v31 = vsub.f32 %v583_v12, %v604_v30 }
 0x207   : > { %v613_v32 = vmul.f32 1.442695, %v611_v31 }
 0x208   : > { %v609_v33 = vpop.permute.xlu1 %608 }
 0x209   : > { %967 = vpow2.f32 %v613_v32  ;;  %v612_v34 = vsub.f32 %v584_v16, %v609_v33 }
 0x20b   : > { %v615_v35 = vmul.f32 1.442695, %v612_v34 }
 0x20d   : > { %969 = vpow2.f32 %v615_v35 }
 0x20e   : > { %971 = vpow2.f32 %v599_v41 }
 0x20f   : > { %973 = vpow2.f32 %v597_v42 }
 0x213   : > { %v968_v36 = vpop.eup %967 }
 0x214   : > { %v621_v37 = vsel %vm306_vm0, %v968_v36, 0.0 }
 0x215   : > { %622 = vadd.xlane.f32.xlu0 %v621_v37 }
 0x217   : > { %v970_v38 = vpop.eup %969 }
 0x218   : > { %v624_v39 = vsel %vm306_vm0, %v970_v38, 0.0  ;;  %v645_v40 = vpack.c.bf16 %v970_v38, %v968_v36  ;;  %v972_v43 = vpop.eup %971 }
 0x219   : > { %625 = vadd.xlane.f32.xlu1 %v624_v39  ;;  %v974_v44 = vpop.eup %973  ;;  %v620_v50 = vmul.f32 %v972_v43, %v618_v48 }
 0x21a   : > { %917 = vmatmul.mubr.msk.bf16.vlgmr.msra.gmra.mrb[0].mxu1 %vm306_vm0, %v645_v40  ;;  %v619_v46 = vmul.f32 %v974_v44, %v617_v45 }
 0x22a   : > { %640 = vperm.xlu1 %964, %v972_v43  }
 0x22b   : > { %635 = vperm.xlu0 %965, %v974_v44  }
 0x2a2   : > { %v623_v47 = vpop.xlane.xlu0 %622 }
 0x2a3   : > { %v627_v49 = vadd.f32 %v623_v47, %v619_v46 }
 0x2a5   : > { %629 = vst.msk [vmem:[#allocation3] sm:$0xff] %vm301_vm2, %v627_v49 }
 0x2a6   : > { %v626_v51 = vpop.xlane.xlu1 %625 }
 0x2a7   : > { %v628_v52 = vadd.f32 %v626_v51, %v620_v50 }
 0x2a9   : > { %630 = vst.msk [vmem:[#allocation3 + $0x8] sm:$0xff] %vm301_vm2, %v628_v52 }
 0x2aa   : > { %v636_v58 = vpop.permute.xlu0 %635  ;;  %v641_v60 = vpop.permute.xlu1 %640 }
 0x2ab   : > { %v643_v61 = vmul.f32 %v636_v58, %v631_v57  ;;  %v644_v63 = vmul.f32 %v641_v60, %v632_v59 }
 0x2ac   : > { %v700_v53 = vld [vmem:[#allocation3] sm:$0xff] }
 0x2ad   : > { %975 = vrcp.f32 %v700_v53 }
 0x2b0   : > { %v701_v54 = vld [vmem:[#allocation3 + $0x8] sm:$0xff] }
 0x2b1   : > { %977 = vrcp.f32 %v701_v54 }
 0x2b7   : > { %v976_v55 = vpop.eup %975 }
 0x2b8   : > { %708 = vperm.xlu0 %965, %v976_v55  }
 0x2bb   : > { %v978_v56 = vpop.eup %977 }
 0x2bc   : > { %713 = vperm.xlu0 %965, %v978_v56  }
 0x2ed   : > { %v687_v62 = vpop.f32.mrb[0].mxu1 }
 0x2ee   : > { %v694_v0 = vadd.f32 %v687_v62, %v643_v61  ;;  %v918_v1 = vpop.f32.mrb[1].mxu1 }
 0x2ef   : > { %v690_v2 = vpop.f32.mrb[2].mxu1 }
 0x2f0   : > { %696 = vst.msk [vmem:[#allocation4] sm:$0xff] %vm306_vm0, %v694_v0  ;;  %v695_v3 = vadd.f32 %v690_v2, %v644_v63  ;;  %v919_v4 = vpop.f32.mrb[3].mxu1 }
 0x2f2   : > { %697 = vst.msk [vmem:[#allocation4 + $0x8] sm:$0xff] %vm306_vm0, %v695_v3 }
 0x2f7   : > { %v704_v5 = vld [vmem:[#allocation4] sm:$0xff] }
 0x2f9   : > { %v705_v9 = vld [vmem:[#allocation4 + $0x8] sm:$0xff] }
 0x337   : > { %v709_v6 = vpop.permute.xlu0 %708 }
 0x338   : > { %v716_v7 = vmul.f32 %v709_v6, %v704_v5 }
 0x33a   : > { %v718_v8 = vpack.c.bf16 %v716_v7, %v716_v7 }
 0x33b   : > { %v714_v10 = vpop.permute.xlu0 %713 }
 0x33c   : > { %721 = vst.msk [vmem:[%s296_s10] sm:$0xf] %vm720_vm6, %v718_v8  ;;  %v717_v11 = vmul.f32 %v714_v10, %v705_v9 }
 0x33e   : > { %v719_v12 = vpack.c.bf16 %v717_v11, %v717_v11 }
 0x340   : > { %722 = vst.msk [vmem:[%s296_s10 + $0x4] sm:$0xf] %vm720_vm6, %v719_v12 }
 0x341 PF: > { %s13_s16 = sadd.s32 1, %s1017_s16   ;;  %s1142_s12 = smov %s1009_s14 }
 0x342   : > { %p10_p8 = scmp.ge.s32.totalorder %s13_s16, 6   ;;  %s1143_s13 = smov %s1013_s15 }
 0x343   : > { %s1144_s14 = smov %s1147_s17  ;;  %s1145_s15 = smov %s1151_s18 }
 0x344   :  { %12 = sbr.rel (!%p10_p8) target bundleno = 3 (0x3), region = 90 }

</bundles_post_ra>
